<compile_context>
chip_gen: v7x
topology: tpu7x:2x2x1
jax: 0.10.0
libtpu: 0.0.40
codegen_flags: <defaults>
</compile_context>

<pallas_src>
from functools import partial

import jax
import jax.numpy as jnp
from jax.experimental import pallas as pl
from jax.experimental.pallas import tpu as pltpu

BETA = 0.95
THRESHOLD = 1.0
NUM_STEPS = 25
LANE = 128


def _round_up(n, m):
    return ((n + m - 1) // m) * m


def snn_kernel(x_ref, w1_ref, b1_ref, w2_ref, b2_ref,
               spk_out_ref, mem_out_ref, spk1_buf):
    B = x_ref.shape[0]
    num_steps = spk_out_ref.shape[0] // B
    H = w1_ref.shape[1]
    O = w2_ref.shape[1]

    # ---- Phase 0: loop-invariant layer-1 pre-activation (single K=784 matmul).
    # Refs feed the dot directly; nothing large stays live past this line.
    cur1 = (jnp.dot(x_ref[...], w1_ref[...], preferred_element_type=jnp.float32)
            + b1_ref[...])

    # ---- Phase 1: layer-1 Leaky recurrence; stash every spk1 row-block. ----
    mem1 = jnp.zeros((B, H), jnp.float32)
    for t in range(num_steps):
        reset1 = (mem1 > THRESHOLD).astype(jnp.float32)
        mem1 = BETA * mem1 + cur1 - reset1 * THRESHOLD
        spk1 = (mem1 > THRESHOLD).astype(jnp.float32)
        spk1_buf[t * B:(t + 1) * B, :] = spk1

    # ---- Phase 2: ONE time-batched fc2 matmul over all steps (M = steps*B). --
    cur2_all = (jnp.dot(spk1_buf[...], w2_ref[...],
                        preferred_element_type=jnp.float32)
                + b2_ref[...])

    # ---- Phase 3: elementwise layer-2 Leaky recurrence + lane-dense stores. --
    mem2 = jnp.zeros((B, O), jnp.float32)
    for t in range(num_steps):
        cur2 = cur2_all[t * B:(t + 1) * B, :]
        reset2 = (mem2 > THRESHOLD).astype(jnp.float32)
        mem2 = BETA * mem2 + cur2 - reset2 * THRESHOLD
        spk2 = (mem2 > THRESHOLD).astype(jnp.float32)
        spk_out_ref[t * B:(t + 1) * B, :] = spk2
        mem_out_ref[t * B:(t + 1) * B, :] = mem2


def pad_params(w1, b1, w2, b2):
    """Zero-pad feature dims to full 128-lane width (done once, outside jit).

    Padded lanes get zero weights/bias, so their membranes stay at 0 < threshold
    and never spike; real outputs are bit-identical to the unpadded computation.
    """
    num_inputs, num_hidden = w1.shape
    num_outputs = w2.shape[1]
    h_pad = _round_up(num_hidden, LANE)
    o_pad = _round_up(num_outputs, LANE)

    w1p = jnp.zeros((num_inputs, h_pad), jnp.float32).at[:, :num_hidden].set(w1)
    b1p = jnp.zeros((1, h_pad), jnp.float32).at[:, :num_hidden].set(b1)
    w2p = jnp.zeros((h_pad, o_pad), jnp.float32).at[:num_hidden, :num_outputs].set(w2)
    b2p = jnp.zeros((1, o_pad), jnp.float32).at[:, :num_outputs].set(b2)
    return w1p, b1p, w2p, b2p


@partial(jax.jit, static_argnames=("num_steps", "num_outputs"))
def snn_forward(x, w1p, b1p, w2p, b2p, *, num_steps=NUM_STEPS, num_outputs=10):
    B = x.shape[0]
    h_pad = w1p.shape[1]
    o_pad = w2p.shape[1]

    vmem_spec = pl.BlockSpec(memory_space=pltpu.MemorySpace.VMEM)

    spk_flat, mem_flat = pl.pallas_call(
        snn_kernel,
        out_shape=(
            jax.ShapeDtypeStruct((num_steps * B, o_pad), jnp.float32),
            jax.ShapeDtypeStruct((num_steps * B, o_pad), jnp.float32),
        ),
        in_specs=[vmem_spec] * 5,
        out_specs=(vmem_spec, vmem_spec),
        scratch_shapes=[pltpu.VMEM((num_steps * B, h_pad), jnp.float32)],
    )(x, w1p, b1p, w2p, b2p)

    spk = spk_flat.reshape(num_steps, B, o_pad)[:, :, :num_outputs]
    mem = mem_flat.reshape(num_steps, B, o_pad)[:, :, :num_outputs]
    return spk, mem


def snn_reference(x, w1, b1, w2, b2, num_steps=NUM_STEPS):
    """Pure-JAX reference mirroring the PyTorch/snntorch forward."""
    B = x.shape[0]
    mem1 = jnp.zeros((B, w1.shape[1]), jnp.float32)
    mem2 = jnp.zeros((B, w2.shape[1]), jnp.float32)
    spk_rec, mem_rec = [], []
    for _ in range(num_steps):
        cur1 = x @ w1 + b1
        reset1 = (mem1 > THRESHOLD).astype(jnp.float32)
        mem1 = BETA * mem1 + cur1 - reset1 * THRESHOLD
        spk1 = (mem1 > THRESHOLD).astype(jnp.float32)
        cur2 = spk1 @ w2 + b2
        reset2 = (mem2 > THRESHOLD).astype(jnp.float32)
        mem2 = BETA * mem2 + cur2 - reset2 * THRESHOLD
        spk2 = (mem2 > THRESHOLD).astype(jnp.float32)
        spk_rec.append(spk2)
        mem_rec.append(mem2)
    return jnp.stack(spk_rec, 0), jnp.stack(mem_rec, 0)


if __name__ == "__main__":
    # Module-consistent sizes: num_inputs=28*28, num_outputs=10; small batch & hidden.
    num_inputs, num_hidden, num_outputs = 28 * 28, 32, 10
    batch = 2

    key = jax.random.PRNGKey(0)
    kx, kw1, kb1, kw2, kb2 = jax.random.split(key, 5)

    x = jax.random.normal(kx, (batch, num_inputs), jnp.float32)

    # Deterministic init (PyTorch-Linear-style uniform bounds), stored
    # pre-transposed to (in_features, out_features).
    bound1 = 1.0 / (num_inputs ** 0.5)
    w1 = jax.random.uniform(kw1, (num_inputs, num_hidden), jnp.float32, -bound1, bound1)
    b1 = jax.random.uniform(kb1, (1, num_hidden), jnp.float32, -bound1, bound1)
    bound2 = 1.0 / (num_hidden ** 0.5)
    w2 = jax.random.uniform(kw2, (num_hidden, num_outputs), jnp.float32, -bound2, bound2)
    b2 = jax.random.uniform(kb2, (1, num_outputs), jnp.float32, -bound2, bound2)

    # Pad parameters once (cached); forward itself is jitted.
    w1p, b1p, w2p, b2p = pad_params(w1, b1, w2, b2)

    spk2_rec, mem2_rec = snn_forward(x, w1p, b1p, w2p, b2p,
                                     num_steps=NUM_STEPS, num_outputs=num_outputs)
    jax.block_until_ready((spk2_rec, mem2_rec))

    spk_ref, mem_ref = snn_reference(x, w1, b1, w2, b2)
    assert spk2_rec.shape == (NUM_STEPS, batch, num_outputs)
    assert mem2_rec.shape == (NUM_STEPS, batch, num_outputs)
    assert jnp.allclose(spk2_rec, spk_ref, atol=1e-5)
    assert jnp.allclose(mem2_rec, mem_ref, atol=1e-5)

    print("KERNEL_OK")
</pallas_src>

<mosaic_0001>
module attributes {stable_mosaic.version = 11 : i64} {
  func.func @snn_kernel(%arg0: memref<2x784xf32, #tpu.memory_space<vmem>>, %arg1: memref<784x128xf32, #tpu.memory_space<vmem>>, %arg2: memref<1x128xf32, #tpu.memory_space<vmem>>, %arg3: memref<128x128xf32, #tpu.memory_space<vmem>>, %arg4: memref<1x128xf32, #tpu.memory_space<vmem>>, %arg5: memref<50x128xf32, #tpu.memory_space<vmem>>, %arg6: memref<50x128xf32, #tpu.memory_space<vmem>>, %arg7: memref<50x128xf32, #tpu.memory_space<vmem>>) attributes {dimension_semantics = [], scalar_prefetch = 0 : i64, scratch_operands = 1 : i64, tpu.core_type = #tpu.core_type<tc>} {
    %c0 = arith.constant 0 : index
    %c0_0 = arith.constant 0 : index
    %0 = vector.load %arg0[%c0, %c0_0] : memref<2x784xf32, #tpu.memory_space<vmem>>, vector<2x784xf32>
    %c0_1 = arith.constant 0 : index
    %c0_2 = arith.constant 0 : index
    %1 = vector.load %arg1[%c0_1, %c0_2] : memref<784x128xf32, #tpu.memory_space<vmem>>, vector<784x128xf32>
    %cst = arith.constant dense<0.000000e+00> : vector<2x128xf32>
    %2 = tpu.matmul %0, %1, %cst {dimension_numbers = #tpu.dot_dimension_numbers<[1], [0], [0], [1], [0, 0, 1, 1], [], []>} : vector<2x784xf32>, vector<784x128xf32>, vector<2x128xf32> -> vector<2x128xf32>
    %c0_3 = arith.constant 0 : index
    %c0_4 = arith.constant 0 : index
    %3 = vector.load %arg2[%c0_3, %c0_4] : memref<1x128xf32, #tpu.memory_space<vmem>>, vector<1x128xf32>
    %4 = vector.broadcast %3 : vector<1x128xf32> to vector<2x128xf32>
    %5 = arith.addf %2, %4 : vector<2x128xf32>
    %cst_5 = arith.constant 0.000000e+00 : f32
    %6 = vector.broadcast %cst_5 : f32 to vector<2x128xf32>
    %cst_6 = arith.constant 1.000000e+00 : f32
    %7 = vector.broadcast %cst_6 : f32 to vector<2x128xf32>
    %8 = arith.cmpf ogt, %6, %7 : vector<2x128xf32>
    %9 = arith.extui %8 : vector<2x128xi1> to vector<2x128xi32>
    %10 = arith.sitofp %9 : vector<2x128xi32> to vector<2x128xf32>
    %cst_7 = arith.constant 0.949999988 : f32
    %11 = vector.broadcast %cst_7 : f32 to vector<2x128xf32>
    %12 = arith.mulf %11, %6 : vector<2x128xf32>
    %13 = arith.addf %12, %5 : vector<2x128xf32>
    %cst_8 = arith.constant 1.000000e+00 : f32
    %14 = vector.broadcast %cst_8 : f32 to vector<2x128xf32>
    %15 = arith.mulf %10, %14 : vector<2x128xf32>
    %16 = arith.subf %13, %15 : vector<2x128xf32>
    %cst_9 = arith.constant 1.000000e+00 : f32
    %17 = vector.broadcast %cst_9 : f32 to vector<2x128xf32>
    %18 = arith.cmpf ogt, %16, %17 : vector<2x128xf32>
    %19 = arith.extui %18 : vector<2x128xi1> to vector<2x128xi32>
    %20 = arith.sitofp %19 : vector<2x128xi32> to vector<2x128xf32>
    %c0_10 = arith.constant 0 : index
    %c0_11 = arith.constant 0 : index
    %21 = vector.load %arg7[%c0_10, %c0_11] : memref<50x128xf32, #tpu.memory_space<vmem>>, vector<2x128xf32>
    tpu.vector_store %arg7[%c0_10, %c0_11], %20 {strides = array<i32>} : memref<50x128xf32, #tpu.memory_space<vmem>>, vector<2x128xf32>,
    %cst_12 = arith.constant 1.000000e+00 : f32
    %22 = vector.broadcast %cst_12 : f32 to vector<2x128xf32>
    %23 = arith.cmpf ogt, %16, %22 : vector<2x128xf32>
    %24 = arith.extui %23 : vector<2x128xi1> to vector<2x128xi32>
    %25 = arith.sitofp %24 : vector<2x128xi32> to vector<2x128xf32>
    %cst_13 = arith.constant 0.949999988 : f32
    %26 = vector.broadcast %cst_13 : f32 to vector<2x128xf32>
    %27 = arith.mulf %26, %16 : vector<2x128xf32>
    %28 = arith.addf %27, %5 : vector<2x128xf32>
    %cst_14 = arith.constant 1.000000e+00 : f32
    %29 = vector.broadcast %cst_14 : f32 to vector<2x128xf32>
    %30 = arith.mulf %25, %29 : vector<2x128xf32>
    %31 = arith.subf %28, %30 : vector<2x128xf32>
    %cst_15 = arith.constant 1.000000e+00 : f32
    %32 = vector.broadcast %cst_15 : f32 to vector<2x128xf32>
    %33 = arith.cmpf ogt, %31, %32 : vector<2x128xf32>
    %34 = arith.extui %33 : vector<2x128xi1> to vector<2x128xi32>
    %35 = arith.sitofp %34 : vector<2x128xi32> to vector<2x128xf32>
    %c2 = arith.constant 2 : index
    %c0_16 = arith.constant 0 : index
    %36 = vector.load %arg7[%c2, %c0_16] : memref<50x128xf32, #tpu.memory_space<vmem>>, vector<2x128xf32>
    tpu.vector_store %arg7[%c2, %c0_16], %35 {strides = array<i32>} : memref<50x128xf32, #tpu.memory_space<vmem>>, vector<2x128xf32>,
    %cst_17 = arith.constant 1.000000e+00 : f32
    %37 = vector.broadcast %cst_17 : f32 to vector<2x128xf32>
    %38 = arith.cmpf ogt, %31, %37 : vector<2x128xf32>
    %39 = arith.extui %38 : vector<2x128xi1> to vector<2x128xi32>
    %40 = arith.sitofp %39 : vector<2x128xi32> to vector<2x128xf32>
    %cst_18 = arith.constant 0.949999988 : f32
    %41 = vector.broadcast %cst_18 : f32 to vector<2x128xf32>
    %42 = arith.mulf %41, %31 : vector<2x128xf32>
    %43 = arith.addf %42, %5 : vector<2x128xf32>
    %cst_19 = arith.constant 1.000000e+00 : f32
    %44 = vector.broadcast %cst_19 : f32 to vector<2x128xf32>
    %45 = arith.mulf %40, %44 : vector<2x128xf32>
    %46 = arith.subf %43, %45 : vector<2x128xf32>
    %cst_20 = arith.constant 1.000000e+00 : f32
    %47 = vector.broadcast %cst_20 : f32 to vector<2x128xf32>
    %48 = arith.cmpf ogt, %46, %47 : vector<2x128xf32>
    %49 = arith.extui %48 : vector<2x128xi1> to vector<2x128xi32>
    %50 = arith.sitofp %49 : vector<2x128xi32> to vector<2x128xf32>
    %c4 = arith.constant 4 : index
    %c0_21 = arith.constant 0 : index
    %51 = vector.load %arg7[%c4, %c0_21] : memref<50x128xf32, #tpu.memory_space<vmem>>, vector<2x128xf32>
    tpu.vector_store %arg7[%c4, %c0_21], %50 {strides = array<i32>} : memref<50x128xf32, #tpu.memory_space<vmem>>, vector<2x128xf32>,
    %cst_22 = arith.constant 1.000000e+00 : f32
    %52 = vector.broadcast %cst_22 : f32 to vector<2x128xf32>
    %53 = arith.cmpf ogt, %46, %52 : vector<2x128xf32>
    %54 = arith.extui %53 : vector<2x128xi1> to vector<2x128xi32>
    %55 = arith.sitofp %54 : vector<2x128xi32> to vector<2x128xf32>
    %cst_23 = arith.constant 0.949999988 : f32
    %56 = vector.broadcast %cst_23 : f32 to vector<2x128xf32>
    %57 = arith.mulf %56, %46 : vector<2x128xf32>
    %58 = arith.addf %57, %5 : vector<2x128xf32>
    %cst_24 = arith.constant 1.000000e+00 : f32
    %59 = vector.broadcast %cst_24 : f32 to vector<2x128xf32>
    %60 = arith.mulf %55, %59 : vector<2x128xf32>
    %61 = arith.subf %58, %60 : vector<2x128xf32>
    %cst_25 = arith.constant 1.000000e+00 : f32
    %62 = vector.broadcast %cst_25 : f32 to vector<2x128xf32>
    %63 = arith.cmpf ogt, %61, %62 : vector<2x128xf32>
    %64 = arith.extui %63 : vector<2x128xi1> to vector<2x128xi32>
    %65 = arith.sitofp %64 : vector<2x128xi32> to vector<2x128xf32>
    %c6 = arith.constant 6 : index
    %c0_26 = arith.constant 0 : index
    %66 = vector.load %arg7[%c6, %c0_26] : memref<50x128xf32, #tpu.memory_space<vmem>>, vector<2x128xf32>
    tpu.vector_store %arg7[%c6, %c0_26], %65 {strides = array<i32>} : memref<50x128xf32, #tpu.memory_space<vmem>>, vector<2x128xf32>,
    %cst_27 = arith.constant 1.000000e+00 : f32
    %67 = vector.broadcast %cst_27 : f32 to vector<2x128xf32>
    %68 = arith.cmpf ogt, %61, %67 : vector<2x128xf32>
    %69 = arith.extui %68 : vector<2x128xi1> to vector<2x128xi32>
    %70 = arith.sitofp %69 : vector<2x128xi32> to vector<2x128xf32>
    %cst_28 = arith.constant 0.949999988 : f32
    %71 = vector.broadcast %cst_28 : f32 to vector<2x128xf32>
    %72 = arith.mulf %71, %61 : vector<2x128xf32>
    %73 = arith.addf %72, %5 : vector<2x128xf32>
    %cst_29 = arith.constant 1.000000e+00 : f32
    %74 = vector.broadcast %cst_29 : f32 to vector<2x128xf32>
    %75 = arith.mulf %70, %74 : vector<2x128xf32>
    %76 = arith.subf %73, %75 : vector<2x128xf32>
    %cst_30 = arith.constant 1.000000e+00 : f32
    %77 = vector.broadcast %cst_30 : f32 to vector<2x128xf32>
    %78 = arith.cmpf ogt, %76, %77 : vector<2x128xf32>
    %79 = arith.extui %78 : vector<2x128xi1> to vector<2x128xi32>
    %80 = arith.sitofp %79 : vector<2x128xi32> to vector<2x128xf32>
    %c8 = arith.constant 8 : index
    %c0_31 = arith.constant 0 : index
    %81 = vector.load %arg7[%c8, %c0_31] : memref<50x128xf32, #tpu.memory_space<vmem>>, vector<2x128xf32>
    tpu.vector_store %arg7[%c8, %c0_31], %80 {strides = array<i32>} : memref<50x128xf32, #tpu.memory_space<vmem>>, vector<2x128xf32>,
    %cst_32 = arith.constant 1.000000e+00 : f32
    %82 = vector.broadcast %cst_32 : f32 to vector<2x128xf32>
    %83 = arith.cmpf ogt, %76, %82 : vector<2x128xf32>
    %84 = arith.extui %83 : vector<2x128xi1> to vector<2x128xi32>
    %85 = arith.sitofp %84 : vector<2x128xi32> to vector<2x128xf32>
    %cst_33 = arith.constant 0.949999988 : f32
    %86 = vector.broadcast %cst_33 : f32 to vector<2x128xf32>
    %87 = arith.mulf %86, %76 : vector<2x128xf32>
    %88 = arith.addf %87, %5 : vector<2x128xf32>
    %cst_34 = arith.constant 1.000000e+00 : f32
    %89 = vector.broadcast %cst_34 : f32 to vector<2x128xf32>
    %90 = arith.mulf %85, %89 : vector<2x128xf32>
    %91 = arith.subf %88, %90 : vector<2x128xf32>
    %cst_35 = arith.constant 1.000000e+00 : f32
    %92 = vector.broadcast %cst_35 : f32 to vector<2x128xf32>
    %93 = arith.cmpf ogt, %91, %92 : vector<2x128xf32>
    %94 = arith.extui %93 : vector<2x128xi1> to vector<2x128xi32>
    %95 = arith.sitofp %94 : vector<2x128xi32> to vector<2x128xf32>
    %c10 = arith.constant 10 : index
    %c0_36 = arith.constant 0 : index
    %96 = vector.load %arg7[%c10, %c0_36] : memref<50x128xf32, #tpu.memory_space<vmem>>, vector<2x128xf32>
    tpu.vector_store %arg7[%c10, %c0_36], %95 {strides = array<i32>} : memref<50x128xf32, #tpu.memory_space<vmem>>, vector<2x128xf32>,
    %cst_37 = arith.constant 1.000000e+00 : f32
    %97 = vector.broadcast %cst_37 : f32 to vector<2x128xf32>
    %98 = arith.cmpf ogt, %91, %97 : vector<2x128xf32>
    %99 = arith.extui %98 : vector<2x128xi1> to vector<2x128xi32>
    %100 = arith.sitofp %99 : vector<2x128xi32> to vector<2x128xf32>
    %cst_38 = arith.constant 0.949999988 : f32
    %101 = vector.broadcast %cst_38 : f32 to vector<2x128xf32>
    %102 = arith.mulf %101, %91 : vector<2x128xf32>
    %103 = arith.addf %102, %5 : vector<2x128xf32>
    %cst_39 = arith.constant 1.000000e+00 : f32
    %104 = vector.broadcast %cst_39 : f32 to vector<2x128xf32>
    %105 = arith.mulf %100, %104 : vector<2x128xf32>
    %106 = arith.subf %103, %105 : vector<2x128xf32>
    %cst_40 = arith.constant 1.000000e+00 : f32
    %107 = vector.broadcast %cst_40 : f32 to vector<2x128xf32>
    %108 = arith.cmpf ogt, %106, %107 : vector<2x128xf32>
    %109 = arith.extui %108 : vector<2x128xi1> to vector<2x128xi32>
    %110 = arith.sitofp %109 : vector<2x128xi32> to vector<2x128xf32>
    %c12 = arith.constant 12 : index
    %c0_41 = arith.constant 0 : index
    %111 = vector.load %arg7[%c12, %c0_41] : memref<50x128xf32, #tpu.memory_space<vmem>>, vector<2x128xf32>
    tpu.vector_store %arg7[%c12, %c0_41], %110 {strides = array<i32>} : memref<50x128xf32, #tpu.memory_space<vmem>>, vector<2x128xf32>,
    %cst_42 = arith.constant 1.000000e+00 : f32
    %112 = vector.broadcast %cst_42 : f32 to vector<2x128xf32>
    %113 = arith.cmpf ogt, %106, %112 : vector<2x128xf32>
    %114 = arith.extui %113 : vector<2x128xi1> to vector<2x128xi32>
    %115 = arith.sitofp %114 : vector<2x128xi32> to vector<2x128xf32>
    %cst_43 = arith.constant 0.949999988 : f32
    %116 = vector.broadcast %cst_43 : f32 to vector<2x128xf32>
    %117 = arith.mulf %116, %106 : vector<2x128xf32>
    %118 = arith.addf %117, %5 : vector<2x128xf32>
    %cst_44 = arith.constant 1.000000e+00 : f32
    %119 = vector.broadcast %cst_44 : f32 to vector<2x128xf32>
    %120 = arith.mulf %115, %119 : vector<2x128xf32>
    %121 = arith.subf %118, %120 : vector<2x128xf32>
    %cst_45 = arith.constant 1.000000e+00 : f32
    %122 = vector.broadcast %cst_45 : f32 to vector<2x128xf32>
    %123 = arith.cmpf ogt, %121, %122 : vector<2x128xf32>
    %124 = arith.extui %123 : vector<2x128xi1> to vector<2x128xi32>
    %125 = arith.sitofp %124 : vector<2x128xi32> to vector<2x128xf32>
    %c14 = arith.constant 14 : index
    %c0_46 = arith.constant 0 : index
    %126 = vector.load %arg7[%c14, %c0_46] : memref<50x128xf32, #tpu.memory_space<vmem>>, vector<2x128xf32>
    tpu.vector_store %arg7[%c14, %c0_46], %125 {strides = array<i32>} : memref<50x128xf32, #tpu.memory_space<vmem>>, vector<2x128xf32>,
    %cst_47 = arith.constant 1.000000e+00 : f32
    %127 = vector.broadcast %cst_47 : f32 to vector<2x128xf32>
    %128 = arith.cmpf ogt, %121, %127 : vector<2x128xf32>
    %129 = arith.extui %128 : vector<2x128xi1> to vector<2x128xi32>
    %130 = arith.sitofp %129 : vector<2x128xi32> to vector<2x128xf32>
    %cst_48 = arith.constant 0.949999988 : f32
    %131 = vector.broadcast %cst_48 : f32 to vector<2x128xf32>
    %132 = arith.mulf %131, %121 : vector<2x128xf32>
    %133 = arith.addf %132, %5 : vector<2x128xf32>
    %cst_49 = arith.constant 1.000000e+00 : f32
    %134 = vector.broadcast %cst_49 : f32 to vector<2x128xf32>
    %135 = arith.mulf %130, %134 : vector<2x128xf32>
    %136 = arith.subf %133, %135 : vector<2x128xf32>
    %cst_50 = arith.constant 1.000000e+00 : f32
    %137 = vector.broadcast %cst_50 : f32 to vector<2x128xf32>
    %138 = arith.cmpf ogt, %136, %137 : vector<2x128xf32>
    %139 = arith.extui %138 : vector<2x128xi1> to vector<2x128xi32>
    %140 = arith.sitofp %139 : vector<2x128xi32> to vector<2x128xf32>
    %c16 = arith.constant 16 : index
    %c0_51 = arith.constant 0 : index
    %141 = vector.load %arg7[%c16, %c0_51] : memref<50x128xf32, #tpu.memory_space<vmem>>, vector<2x128xf32>
    tpu.vector_store %arg7[%c16, %c0_51], %140 {strides = array<i32>} : memref<50x128xf32, #tpu.memory_space<vmem>>, vector<2x128xf32>,
    %cst_52 = arith.constant 1.000000e+00 : f32
    %142 = vector.broadcast %cst_52 : f32 to vector<2x128xf32>
    %143 = arith.cmpf ogt, %136, %142 : vector<2x128xf32>
    %144 = arith.extui %143 : vector<2x128xi1> to vector<2x128xi32>
    %145 = arith.sitofp %144 : vector<2x128xi32> to vector<2x128xf32>
    %cst_53 = arith.constant 0.949999988 : f32
    %146 = vector.broadcast %cst_53 : f32 to vector<2x128xf32>
    %147 = arith.mulf %146, %136 : vector<2x128xf32>
    %148 = arith.addf %147, %5 : vector<2x128xf32>
    %cst_54 = arith.constant 1.000000e+00 : f32
    %149 = vector.broadcast %cst_54 : f32 to vector<2x128xf32>
    %150 = arith.mulf %145, %149 : vector<2x128xf32>
    %151 = arith.subf %148, %150 : vector<2x128xf32>
    %cst_55 = arith.constant 1.000000e+00 : f32
    %152 = vector.broadcast %cst_55 : f32 to vector<2x128xf32>
    %153 = arith.cmpf ogt, %151, %152 : vector<2x128xf32>
    %154 = arith.extui %153 : vector<2x128xi1> to vector<2x128xi32>
    %155 = arith.sitofp %154 : vector<2x128xi32> to vector<2x128xf32>
    %c18 = arith.constant 18 : index
    %c0_56 = arith.constant 0 : index
    %156 = vector.load %arg7[%c18, %c0_56] : memref<50x128xf32, #tpu.memory_space<vmem>>, vector<2x128xf32>
    tpu.vector_store %arg7[%c18, %c0_56], %155 {strides = array<i32>} : memref<50x128xf32, #tpu.memory_space<vmem>>, vector<2x128xf32>,
    %cst_57 = arith.constant 1.000000e+00 : f32
    %157 = vector.broadcast %cst_57 : f32 to vector<2x128xf32>
    %158 = arith.cmpf ogt, %151, %157 : vector<2x128xf32>
    %159 = arith.extui %158 : vector<2x128xi1> to vector<2x128xi32>
    %160 = arith.sitofp %159 : vector<2x128xi32> to vector<2x128xf32>
    %cst_58 = arith.constant 0.949999988 : f32
    %161 = vector.broadcast %cst_58 : f32 to vector<2x128xf32>
    %162 = arith.mulf %161, %151 : vector<2x128xf32>
    %163 = arith.addf %162, %5 : vector<2x128xf32>
    %cst_59 = arith.constant 1.000000e+00 : f32
    %164 = vector.broadcast %cst_59 : f32 to vector<2x128xf32>
    %165 = arith.mulf %160, %164 : vector<2x128xf32>
    %166 = arith.subf %163, %165 : vector<2x128xf32>
    %cst_60 = arith.constant 1.000000e+00 : f32
    %167 = vector.broadcast %cst_60 : f32 to vector<2x128xf32>
    %168 = arith.cmpf ogt, %166, %167 : vector<2x128xf32>
    %169 = arith.extui %168 : vector<2x128xi1> to vector<2x128xi32>
    %170 = arith.sitofp %169 : vector<2x128xi32> to vector<2x128xf32>
    %c20 = arith.constant 20 : index
    %c0_61 = arith.constant 0 : index
    %171 = vector.load %arg7[%c20, %c0_61] : memref<50x128xf32, #tpu.memory_space<vmem>>, vector<2x128xf32>
    tpu.vector_store %arg7[%c20, %c0_61], %170 {strides = array<i32>} : memref<50x128xf32, #tpu.memory_space<vmem>>, vector<2x128xf32>,
    %cst_62 = arith.constant 1.000000e+00 : f32
    %172 = vector.broadcast %cst_62 : f32 to vector<2x128xf32>
    %173 = arith.cmpf ogt, %166, %172 : vector<2x128xf32>
    %174 = arith.extui %173 : vector<2x128xi1> to vector<2x128xi32>
    %175 = arith.sitofp %174 : vector<2x128xi32> to vector<2x128xf32>
    %cst_63 = arith.constant 0.949999988 : f32
    %176 = vector.broadcast %cst_63 : f32 to vector<2x128xf32>
    %177 = arith.mulf %176, %166 : vector<2x128xf32>
    %178 = arith.addf %177, %5 : vector<2x128xf32>
    %cst_64 = arith.constant 1.000000e+00 : f32
    %179 = vector.broadcast %cst_64 : f32 to vector<2x128xf32>
    %180 = arith.mulf %175, %179 : vector<2x128xf32>
    %181 = arith.subf %178, %180 : vector<2x128xf32>
    %cst_65 = arith.constant 1.000000e+00 : f32
    %182 = vector.broadcast %cst_65 : f32 to vector<2x128xf32>
    %183 = arith.cmpf ogt, %181, %182 : vector<2x128xf32>
    %184 = arith.extui %183 : vector<2x128xi1> to vector<2x128xi32>
    %185 = arith.sitofp %184 : vector<2x128xi32> to vector<2x128xf32>
    %c22 = arith.constant 22 : index
    %c0_66 = arith.constant 0 : index
    %186 = vector.load %arg7[%c22, %c0_66] : memref<50x128xf32, #tpu.memory_space<vmem>>, vector<2x128xf32>
    tpu.vector_store %arg7[%c22, %c0_66], %185 {strides = array<i32>} : memref<50x128xf32, #tpu.memory_space<vmem>>, vector<2x128xf32>,
    %cst_67 = arith.constant 1.000000e+00 : f32
    %187 = vector.broadcast %cst_67 : f32 to vector<2x128xf32>
    %188 = arith.cmpf ogt, %181, %187 : vector<2x128xf32>
    %189 = arith.extui %188 : vector<2x128xi1> to vector<2x128xi32>
    %190 = arith.sitofp %189 : vector<2x128xi32> to vector<2x128xf32>
    %cst_68 = arith.constant 0.949999988 : f32
    %191 = vector.broadcast %cst_68 : f32 to vector<2x128xf32>
    %192 = arith.mulf %191, %181 : vector<2x128xf32>
    %193 = arith.addf %192, %5 : vector<2x128xf32>
    %cst_69 = arith.constant 1.000000e+00 : f32
    %194 = vector.broadcast %cst_69 : f32 to vector<2x128xf32>
    %195 = arith.mulf %190, %194 : vector<2x128xf32>
    %196 = arith.subf %193, %195 : vector<2x128xf32>
    %cst_70 = arith.constant 1.000000e+00 : f32
    %197 = vector.broadcast %cst_70 : f32 to vector<2x128xf32>
    %198 = arith.cmpf ogt, %196, %197 : vector<2x128xf32>
    %199 = arith.extui %198 : vector<2x128xi1> to vector<2x128xi32>
    %200 = arith.sitofp %199 : vector<2x128xi32> to vector<2x128xf32>
    %c24 = arith.constant 24 : index
    %c0_71 = arith.constant 0 : index
    %201 = vector.load %arg7[%c24, %c0_71] : memref<50x128xf32, #tpu.memory_space<vmem>>, vector<2x128xf32>
    tpu.vector_store %arg7[%c24, %c0_71], %200 {strides = array<i32>} : memref<50x128xf32, #tpu.memory_space<vmem>>, vector<2x128xf32>,
    %cst_72 = arith.constant 1.000000e+00 : f32
    %202 = vector.broadcast %cst_72 : f32 to vector<2x128xf32>
    %203 = arith.cmpf ogt, %196, %202 : vector<2x128xf32>
    %204 = arith.extui %203 : vector<2x128xi1> to vector<2x128xi32>
    %205 = arith.sitofp %204 : vector<2x128xi32> to vector<2x128xf32>
    %cst_73 = arith.constant 0.949999988 : f32
    %206 = vector.broadcast %cst_73 : f32 to vector<2x128xf32>
    %207 = arith.mulf %206, %196 : vector<2x128xf32>
    %208 = arith.addf %207, %5 : vector<2x128xf32>
    %cst_74 = arith.constant 1.000000e+00 : f32
    %209 = vector.broadcast %cst_74 : f32 to vector<2x128xf32>
    %210 = arith.mulf %205, %209 : vector<2x128xf32>
    %211 = arith.subf %208, %210 : vector<2x128xf32>
    %cst_75 = arith.constant 1.000000e+00 : f32
    %212 = vector.broadcast %cst_75 : f32 to vector<2x128xf32>
    %213 = arith.cmpf ogt, %211, %212 : vector<2x128xf32>
    %214 = arith.extui %213 : vector<2x128xi1> to vector<2x128xi32>
    %215 = arith.sitofp %214 : vector<2x128xi32> to vector<2x128xf32>
    %c26 = arith.constant 26 : index
    %c0_76 = arith.constant 0 : index
    %216 = vector.load %arg7[%c26, %c0_76] : memref<50x128xf32, #tpu.memory_space<vmem>>, vector<2x128xf32>
    tpu.vector_store %arg7[%c26, %c0_76], %215 {strides = array<i32>} : memref<50x128xf32, #tpu.memory_space<vmem>>, vector<2x128xf32>,
    %cst_77 = arith.constant 1.000000e+00 : f32
    %217 = vector.broadcast %cst_77 : f32 to vector<2x128xf32>
    %218 = arith.cmpf ogt, %211, %217 : vector<2x128xf32>
    %219 = arith.extui %218 : vector<2x128xi1> to vector<2x128xi32>
    %220 = arith.sitofp %219 : vector<2x128xi32> to vector<2x128xf32>
    %cst_78 = arith.constant 0.949999988 : f32
    %221 = vector.broadcast %cst_78 : f32 to vector<2x128xf32>
    %222 = arith.mulf %221, %211 : vector<2x128xf32>
    %223 = arith.addf %222, %5 : vector<2x128xf32>
    %cst_79 = arith.constant 1.000000e+00 : f32
    %224 = vector.broadcast %cst_79 : f32 to vector<2x128xf32>
    %225 = arith.mulf %220, %224 : vector<2x128xf32>
    %226 = arith.subf %223, %225 : vector<2x128xf32>
    %cst_80 = arith.constant 1.000000e+00 : f32
    %227 = vector.broadcast %cst_80 : f32 to vector<2x128xf32>
    %228 = arith.cmpf ogt, %226, %227 : vector<2x128xf32>
    %229 = arith.extui %228 : vector<2x128xi1> to vector<2x128xi32>
    %230 = arith.sitofp %229 : vector<2x128xi32> to vector<2x128xf32>
    %c28 = arith.constant 28 : index
    %c0_81 = arith.constant 0 : index
    %231 = vector.load %arg7[%c28, %c0_81] : memref<50x128xf32, #tpu.memory_space<vmem>>, vector<2x128xf32>
    tpu.vector_store %arg7[%c28, %c0_81], %230 {strides = array<i32>} : memref<50x128xf32, #tpu.memory_space<vmem>>, vector<2x128xf32>,
    %cst_82 = arith.constant 1.000000e+00 : f32
    %232 = vector.broadcast %cst_82 : f32 to vector<2x128xf32>
    %233 = arith.cmpf ogt, %226, %232 : vector<2x128xf32>
    %234 = arith.extui %233 : vector<2x128xi1> to vector<2x128xi32>
    %235 = arith.sitofp %234 : vector<2x128xi32> to vector<2x128xf32>
    %cst_83 = arith.constant 0.949999988 : f32
    %236 = vector.broadcast %cst_83 : f32 to vector<2x128xf32>
    %237 = arith.mulf %236, %226 : vector<2x128xf32>
    %238 = arith.addf %237, %5 : vector<2x128xf32>
    %cst_84 = arith.constant 1.000000e+00 : f32
    %239 = vector.broadcast %cst_84 : f32 to vector<2x128xf32>
    %240 = arith.mulf %235, %239 : vector<2x128xf32>
    %241 = arith.subf %238, %240 : vector<2x128xf32>
    %cst_85 = arith.constant 1.000000e+00 : f32
    %242 = vector.broadcast %cst_85 : f32 to vector<2x128xf32>
    %243 = arith.cmpf ogt, %241, %242 : vector<2x128xf32>
    %244 = arith.extui %243 : vector<2x128xi1> to vector<2x128xi32>
    %245 = arith.sitofp %244 : vector<2x128xi32> to vector<2x128xf32>
    %c30 = arith.constant 30 : index
    %c0_86 = arith.constant 0 : index
    %246 = vector.load %arg7[%c30, %c0_86] : memref<50x128xf32, #tpu.memory_space<vmem>>, vector<2x128xf32>
    tpu.vector_store %arg7[%c30, %c0_86], %245 {strides = array<i32>} : memref<50x128xf32, #tpu.memory_space<vmem>>, vector<2x128xf32>,
    %cst_87 = arith.constant 1.000000e+00 : f32
    %247 = vector.broadcast %cst_87 : f32 to vector<2x128xf32>
    %248 = arith.cmpf ogt, %241, %247 : vector<2x128xf32>
    %249 = arith.extui %248 : vector<2x128xi1> to vector<2x128xi32>
    %250 = arith.sitofp %249 : vector<2x128xi32> to vector<2x128xf32>
    %cst_88 = arith.constant 0.949999988 : f32
    %251 = vector.broadcast %cst_88 : f32 to vector<2x128xf32>
    %252 = arith.mulf %251, %241 : vector<2x128xf32>
    %253 = arith.addf %252, %5 : vector<2x128xf32>
    %cst_89 = arith.constant 1.000000e+00 : f32
    %254 = vector.broadcast %cst_89 : f32 to vector<2x128xf32>
    %255 = arith.mulf %250, %254 : vector<2x128xf32>
    %256 = arith.subf %253, %255 : vector<2x128xf32>
    %cst_90 = arith.constant 1.000000e+00 : f32
    %257 = vector.broadcast %cst_90 : f32 to vector<2x128xf32>
    %258 = arith.cmpf ogt, %256, %257 : vector<2x128xf32>
    %259 = arith.extui %258 : vector<2x128xi1> to vector<2x128xi32>
    %260 = arith.sitofp %259 : vector<2x128xi32> to vector<2x128xf32>
    %c32 = arith.constant 32 : index
    %c0_91 = arith.constant 0 : index
    %261 = vector.load %arg7[%c32, %c0_91] : memref<50x128xf32, #tpu.memory_space<vmem>>, vector<2x128xf32>
    tpu.vector_store %arg7[%c32, %c0_91], %260 {strides = array<i32>} : memref<50x128xf32, #tpu.memory_space<vmem>>, vector<2x128xf32>,
    %cst_92 = arith.constant 1.000000e+00 : f32
    %262 = vector.broadcast %cst_92 : f32 to vector<2x128xf32>
    %263 = arith.cmpf ogt, %256, %262 : vector<2x128xf32>
    %264 = arith.extui %263 : vector<2x128xi1> to vector<2x128xi32>
    %265 = arith.sitofp %264 : vector<2x128xi32> to vector<2x128xf32>
    %cst_93 = arith.constant 0.949999988 : f32
    %266 = vector.broadcast %cst_93 : f32 to vector<2x128xf32>
    %267 = arith.mulf %266, %256 : vector<2x128xf32>
    %268 = arith.addf %267, %5 : vector<2x128xf32>
    %cst_94 = arith.constant 1.000000e+00 : f32
    %269 = vector.broadcast %cst_94 : f32 to vector<2x128xf32>
    %270 = arith.mulf %265, %269 : vector<2x128xf32>
    %271 = arith.subf %268, %270 : vector<2x128xf32>
    %cst_95 = arith.constant 1.000000e+00 : f32
    %272 = vector.broadcast %cst_95 : f32 to vector<2x128xf32>
    %273 = arith.cmpf ogt, %271, %272 : vector<2x128xf32>
    %274 = arith.extui %273 : vector<2x128xi1> to vector<2x128xi32>
    %275 = arith.sitofp %274 : vector<2x128xi32> to vector<2x128xf32>
    %c34 = arith.constant 34 : index
    %c0_96 = arith.constant 0 : index
    %276 = vector.load %arg7[%c34, %c0_96] : memref<50x128xf32, #tpu.memory_space<vmem>>, vector<2x128xf32>
    tpu.vector_store %arg7[%c34, %c0_96], %275 {strides = array<i32>} : memref<50x128xf32, #tpu.memory_space<vmem>>, vector<2x128xf32>,
    %cst_97 = arith.constant 1.000000e+00 : f32
    %277 = vector.broadcast %cst_97 : f32 to vector<2x128xf32>
    %278 = arith.cmpf ogt, %271, %277 : vector<2x128xf32>
    %279 = arith.extui %278 : vector<2x128xi1> to vector<2x128xi32>
    %280 = arith.sitofp %279 : vector<2x128xi32> to vector<2x128xf32>
    %cst_98 = arith.constant 0.949999988 : f32
    %281 = vector.broadcast %cst_98 : f32 to vector<2x128xf32>
    %282 = arith.mulf %281, %271 : vector<2x128xf32>
    %283 = arith.addf %282, %5 : vector<2x128xf32>
    %cst_99 = arith.constant 1.000000e+00 : f32
    %284 = vector.broadcast %cst_99 : f32 to vector<2x128xf32>
    %285 = arith.mulf %280, %284 : vector<2x128xf32>
    %286 = arith.subf %283, %285 : vector<2x128xf32>
    %cst_100 = arith.constant 1.000000e+00 : f32
    %287 = vector.broadcast %cst_100 : f32 to vector<2x128xf32>
    %288 = arith.cmpf ogt, %286, %287 : vector<2x128xf32>
    %289 = arith.extui %288 : vector<2x128xi1> to vector<2x128xi32>
    %290 = arith.sitofp %289 : vector<2x128xi32> to vector<2x128xf32>
    %c36 = arith.constant 36 : index
    %c0_101 = arith.constant 0 : index
    %291 = vector.load %arg7[%c36, %c0_101] : memref<50x128xf32, #tpu.memory_space<vmem>>, vector<2x128xf32>
    tpu.vector_store %arg7[%c36, %c0_101], %290 {strides = array<i32>} : memref<50x128xf32, #tpu.memory_space<vmem>>, vector<2x128xf32>,
    %cst_102 = arith.constant 1.000000e+00 : f32
    %292 = vector.broadcast %cst_102 : f32 to vector<2x128xf32>
    %293 = arith.cmpf ogt, %286, %292 : vector<2x128xf32>
    %294 = arith.extui %293 : vector<2x128xi1> to vector<2x128xi32>
    %295 = arith.sitofp %294 : vector<2x128xi32> to vector<2x128xf32>
    %cst_103 = arith.constant 0.949999988 : f32
    %296 = vector.broadcast %cst_103 : f32 to vector<2x128xf32>
    %297 = arith.mulf %296, %286 : vector<2x128xf32>
    %298 = arith.addf %297, %5 : vector<2x128xf32>
    %cst_104 = arith.constant 1.000000e+00 : f32
    %299 = vector.broadcast %cst_104 : f32 to vector<2x128xf32>
    %300 = arith.mulf %295, %299 : vector<2x128xf32>
    %301 = arith.subf %298, %300 : vector<2x128xf32>
    %cst_105 = arith.constant 1.000000e+00 : f32
    %302 = vector.broadcast %cst_105 : f32 to vector<2x128xf32>
    %303 = arith.cmpf ogt, %301, %302 : vector<2x128xf32>
    %304 = arith.extui %303 : vector<2x128xi1> to vector<2x128xi32>
    %305 = arith.sitofp %304 : vector<2x128xi32> to vector<2x128xf32>
    %c38 = arith.constant 38 : index
    %c0_106 = arith.constant 0 : index
    %306 = vector.load %arg7[%c38, %c0_106] : memref<50x128xf32, #tpu.memory_space<vmem>>, vector<2x128xf32>
    tpu.vector_store %arg7[%c38, %c0_106], %305 {strides = array<i32>} : memref<50x128xf32, #tpu.memory_space<vmem>>, vector<2x128xf32>,
    %cst_107 = arith.constant 1.000000e+00 : f32
    %307 = vector.broadcast %cst_107 : f32 to vector<2x128xf32>
    %308 = arith.cmpf ogt, %301, %307 : vector<2x128xf32>
    %309 = arith.extui %308 : vector<2x128xi1> to vector<2x128xi32>
    %310 = arith.sitofp %309 : vector<2x128xi32> to vector<2x128xf32>
    %cst_108 = arith.constant 0.949999988 : f32
    %311 = vector.broadcast %cst_108 : f32 to vector<2x128xf32>
    %312 = arith.mulf %311, %301 : vector<2x128xf32>
    %313 = arith.addf %312, %5 : vector<2x128xf32>
    %cst_109 = arith.constant 1.000000e+00 : f32
    %314 = vector.broadcast %cst_109 : f32 to vector<2x128xf32>
    %315 = arith.mulf %310, %314 : vector<2x128xf32>
    %316 = arith.subf %313, %315 : vector<2x128xf32>
    %cst_110 = arith.constant 1.000000e+00 : f32
    %317 = vector.broadcast %cst_110 : f32 to vector<2x128xf32>
    %318 = arith.cmpf ogt, %316, %317 : vector<2x128xf32>
    %319 = arith.extui %318 : vector<2x128xi1> to vector<2x128xi32>
    %320 = arith.sitofp %319 : vector<2x128xi32> to vector<2x128xf32>
    %c40 = arith.constant 40 : index
    %c0_111 = arith.constant 0 : index
    %321 = vector.load %arg7[%c40, %c0_111] : memref<50x128xf32, #tpu.memory_space<vmem>>, vector<2x128xf32>
    tpu.vector_store %arg7[%c40, %c0_111], %320 {strides = array<i32>} : memref<50x128xf32, #tpu.memory_space<vmem>>, vector<2x128xf32>,
    %cst_112 = arith.constant 1.000000e+00 : f32
    %322 = vector.broadcast %cst_112 : f32 to vector<2x128xf32>
    %323 = arith.cmpf ogt, %316, %322 : vector<2x128xf32>
    %324 = arith.extui %323 : vector<2x128xi1> to vector<2x128xi32>
    %325 = arith.sitofp %324 : vector<2x128xi32> to vector<2x128xf32>
    %cst_113 = arith.constant 0.949999988 : f32
    %326 = vector.broadcast %cst_113 : f32 to vector<2x128xf32>
    %327 = arith.mulf %326, %316 : vector<2x128xf32>
    %328 = arith.addf %327, %5 : vector<2x128xf32>
    %cst_114 = arith.constant 1.000000e+00 : f32
    %329 = vector.broadcast %cst_114 : f32 to vector<2x128xf32>
    %330 = arith.mulf %325, %329 : vector<2x128xf32>
    %331 = arith.subf %328, %330 : vector<2x128xf32>
    %cst_115 = arith.constant 1.000000e+00 : f32
    %332 = vector.broadcast %cst_115 : f32 to vector<2x128xf32>
    %333 = arith.cmpf ogt, %331, %332 : vector<2x128xf32>
    %334 = arith.extui %333 : vector<2x128xi1> to vector<2x128xi32>
    %335 = arith.sitofp %334 : vector<2x128xi32> to vector<2x128xf32>
    %c42 = arith.constant 42 : index
    %c0_116 = arith.constant 0 : index
    %336 = vector.load %arg7[%c42, %c0_116] : memref<50x128xf32, #tpu.memory_space<vmem>>, vector<2x128xf32>
    tpu.vector_store %arg7[%c42, %c0_116], %335 {strides = array<i32>} : memref<50x128xf32, #tpu.memory_space<vmem>>, vector<2x128xf32>,
    %cst_117 = arith.constant 1.000000e+00 : f32
    %337 = vector.broadcast %cst_117 : f32 to vector<2x128xf32>
    %338 = arith.cmpf ogt, %331, %337 : vector<2x128xf32>
    %339 = arith.extui %338 : vector<2x128xi1> to vector<2x128xi32>
    %340 = arith.sitofp %339 : vector<2x128xi32> to vector<2x128xf32>
    %cst_118 = arith.constant 0.949999988 : f32
    %341 = vector.broadcast %cst_118 : f32 to vector<2x128xf32>
    %342 = arith.mulf %341, %331 : vector<2x128xf32>
    %343 = arith.addf %342, %5 : vector<2x128xf32>
    %cst_119 = arith.constant 1.000000e+00 : f32
    %344 = vector.broadcast %cst_119 : f32 to vector<2x128xf32>
    %345 = arith.mulf %340, %344 : vector<2x128xf32>
    %346 = arith.subf %343, %345 : vector<2x128xf32>
    %cst_120 = arith.constant 1.000000e+00 : f32
    %347 = vector.broadcast %cst_120 : f32 to vector<2x128xf32>
    %348 = arith.cmpf ogt, %346, %347 : vector<2x128xf32>
    %349 = arith.extui %348 : vector<2x128xi1> to vector<2x128xi32>
    %350 = arith.sitofp %349 : vector<2x128xi32> to vector<2x128xf32>
    %c44 = arith.constant 44 : index
    %c0_121 = arith.constant 0 : index
    %351 = vector.load %arg7[%c44, %c0_121] : memref<50x128xf32, #tpu.memory_space<vmem>>, vector<2x128xf32>
    tpu.vector_store %arg7[%c44, %c0_121], %350 {strides = array<i32>} : memref<50x128xf32, #tpu.memory_space<vmem>>, vector<2x128xf32>,
    %cst_122 = arith.constant 1.000000e+00 : f32
    %352 = vector.broadcast %cst_122 : f32 to vector<2x128xf32>
    %353 = arith.cmpf ogt, %346, %352 : vector<2x128xf32>
    %354 = arith.extui %353 : vector<2x128xi1> to vector<2x128xi32>
    %355 = arith.sitofp %354 : vector<2x128xi32> to vector<2x128xf32>
    %cst_123 = arith.constant 0.949999988 : f32
    %356 = vector.broadcast %cst_123 : f32 to vector<2x128xf32>
    %357 = arith.mulf %356, %346 : vector<2x128xf32>
    %358 = arith.addf %357, %5 : vector<2x128xf32>
    %cst_124 = arith.constant 1.000000e+00 : f32
    %359 = vector.broadcast %cst_124 : f32 to vector<2x128xf32>
    %360 = arith.mulf %355, %359 : vector<2x128xf32>
    %361 = arith.subf %358, %360 : vector<2x128xf32>
    %cst_125 = arith.constant 1.000000e+00 : f32
    %362 = vector.broadcast %cst_125 : f32 to vector<2x128xf32>
    %363 = arith.cmpf ogt, %361, %362 : vector<2x128xf32>
    %364 = arith.extui %363 : vector<2x128xi1> to vector<2x128xi32>
    %365 = arith.sitofp %364 : vector<2x128xi32> to vector<2x128xf32>
    %c46 = arith.constant 46 : index
    %c0_126 = arith.constant 0 : index
    %366 = vector.load %arg7[%c46, %c0_126] : memref<50x128xf32, #tpu.memory_space<vmem>>, vector<2x128xf32>
    tpu.vector_store %arg7[%c46, %c0_126], %365 {strides = array<i32>} : memref<50x128xf32, #tpu.memory_space<vmem>>, vector<2x128xf32>,
    %cst_127 = arith.constant 1.000000e+00 : f32
    %367 = vector.broadcast %cst_127 : f32 to vector<2x128xf32>
    %368 = arith.cmpf ogt, %361, %367 : vector<2x128xf32>
    %369 = arith.extui %368 : vector<2x128xi1> to vector<2x128xi32>
    %370 = arith.sitofp %369 : vector<2x128xi32> to vector<2x128xf32>
    %cst_128 = arith.constant 0.949999988 : f32
    %371 = vector.broadcast %cst_128 : f32 to vector<2x128xf32>
    %372 = arith.mulf %371, %361 : vector<2x128xf32>
    %373 = arith.addf %372, %5 : vector<2x128xf32>
    %cst_129 = arith.constant 1.000000e+00 : f32
    %374 = vector.broadcast %cst_129 : f32 to vector<2x128xf32>
    %375 = arith.mulf %370, %374 : vector<2x128xf32>
    %376 = arith.subf %373, %375 : vector<2x128xf32>
    %cst_130 = arith.constant 1.000000e+00 : f32
    %377 = vector.broadcast %cst_130 : f32 to vector<2x128xf32>
    %378 = arith.cmpf ogt, %376, %377 : vector<2x128xf32>
    %379 = arith.extui %378 : vector<2x128xi1> to vector<2x128xi32>
    %380 = arith.sitofp %379 : vector<2x128xi32> to vector<2x128xf32>
    %c48 = arith.constant 48 : index
    %c0_131 = arith.constant 0 : index
    %381 = vector.load %arg7[%c48, %c0_131] : memref<50x128xf32, #tpu.memory_space<vmem>>, vector<2x128xf32>
    tpu.vector_store %arg7[%c48, %c0_131], %380 {strides = array<i32>} : memref<50x128xf32, #tpu.memory_space<vmem>>, vector<2x128xf32>,
    %c0_132 = arith.constant 0 : index
    %c0_133 = arith.constant 0 : index
    %382 = vector.load %arg7[%c0_132, %c0_133] : memref<50x128xf32, #tpu.memory_space<vmem>>, vector<50x128xf32>
    %c0_134 = arith.constant 0 : index
    %c0_135 = arith.constant 0 : index
    %383 = vector.load %arg3[%c0_134, %c0_135] : memref<128x128xf32, #tpu.memory_space<vmem>>, vector<128x128xf32>
    %cst_136 = arith.constant dense<0.000000e+00> : vector<50x128xf32>
    %384 = tpu.matmul %382, %383, %cst_136 {dimension_numbers = #tpu.dot_dimension_numbers<[1], [0], [0], [1], [0, 0, 1, 1], [], []>} : vector<50x128xf32>, vector<128x128xf32>, vector<50x128xf32> -> vector<50x128xf32>
    %c0_137 = arith.constant 0 : index
    %c0_138 = arith.constant 0 : index
    %385 = vector.load %arg4[%c0_137, %c0_138] : memref<1x128xf32, #tpu.memory_space<vmem>>, vector<1x128xf32>
    %386 = vector.broadcast %385 : vector<1x128xf32> to vector<50x128xf32>
    %387 = arith.addf %384, %386 : vector<50x128xf32>
    %cst_139 = arith.constant 0.000000e+00 : f32
    %388 = vector.broadcast %cst_139 : f32 to vector<2x128xf32>
    %389 = vector.extract_strided_slice %387 {offsets = [0, 0], sizes = [2, 128], strides = [1, 1]} : vector<50x128xf32> to vector<2x128xf32>
    %cst_140 = arith.constant 1.000000e+00 : f32
    %390 = vector.broadcast %cst_140 : f32 to vector<2x128xf32>
    %391 = arith.cmpf ogt, %388, %390 : vector<2x128xf32>
    %392 = arith.extui %391 : vector<2x128xi1> to vector<2x128xi32>
    %393 = arith.sitofp %392 : vector<2x128xi32> to vector<2x128xf32>
    %cst_141 = arith.constant 0.949999988 : f32
    %394 = vector.broadcast %cst_141 : f32 to vector<2x128xf32>
    %395 = arith.mulf %394, %388 : vector<2x128xf32>
    %396 = arith.addf %395, %389 : vector<2x128xf32>
    %cst_142 = arith.constant 1.000000e+00 : f32
    %397 = vector.broadcast %cst_142 : f32 to vector<2x128xf32>
    %398 = arith.mulf %393, %397 : vector<2x128xf32>
    %399 = arith.subf %396, %398 : vector<2x128xf32>
    %cst_143 = arith.constant 1.000000e+00 : f32
    %400 = vector.broadcast %cst_143 : f32 to vector<2x128xf32>
    %401 = arith.cmpf ogt, %399, %400 : vector<2x128xf32>
    %402 = arith.extui %401 : vector<2x128xi1> to vector<2x128xi32>
    %403 = arith.sitofp %402 : vector<2x128xi32> to vector<2x128xf32>
    %c0_144 = arith.constant 0 : index
    %c0_145 = arith.constant 0 : index
    %404 = vector.load %arg5[%c0_144, %c0_145] : memref<50x128xf32, #tpu.memory_space<vmem>>, vector<2x128xf32>
    tpu.vector_store %arg5[%c0_144, %c0_145], %403 {strides = array<i32>} : memref<50x128xf32, #tpu.memory_space<vmem>>, vector<2x128xf32>,
    %c0_146 = arith.constant 0 : index
    %c0_147 = arith.constant 0 : index
    %405 = vector.load %arg6[%c0_146, %c0_147] : memref<50x128xf32, #tpu.memory_space<vmem>>, vector<2x128xf32>
    tpu.vector_store %arg6[%c0_146, %c0_147], %399 {strides = array<i32>} : memref<50x128xf32, #tpu.memory_space<vmem>>, vector<2x128xf32>,
    %406 = vector.extract_strided_slice %387 {offsets = [2, 0], sizes = [2, 128], strides = [1, 1]} : vector<50x128xf32> to vector<2x128xf32>
    %cst_148 = arith.constant 1.000000e+00 : f32
    %407 = vector.broadcast %cst_148 : f32 to vector<2x128xf32>
    %408 = arith.cmpf ogt, %399, %407 : vector<2x128xf32>
    %409 = arith.extui %408 : vector<2x128xi1> to vector<2x128xi32>
    %410 = arith.sitofp %409 : vector<2x128xi32> to vector<2x128xf32>
    %cst_149 = arith.constant 0.949999988 : f32
    %411 = vector.broadcast %cst_149 : f32 to vector<2x128xf32>
    %412 = arith.mulf %411, %399 : vector<2x128xf32>
    %413 = arith.addf %412, %406 : vector<2x128xf32>
    %cst_150 = arith.constant 1.000000e+00 : f32
    %414 = vector.broadcast %cst_150 : f32 to vector<2x128xf32>
    %415 = arith.mulf %410, %414 : vector<2x128xf32>
    %416 = arith.subf %413, %415 : vector<2x128xf32>
    %cst_151 = arith.constant 1.000000e+00 : f32
    %417 = vector.broadcast %cst_151 : f32 to vector<2x128xf32>
    %418 = arith.cmpf ogt, %416, %417 : vector<2x128xf32>
    %419 = arith.extui %418 : vector<2x128xi1> to vector<2x128xi32>
    %420 = arith.sitofp %419 : vector<2x128xi32> to vector<2x128xf32>
    %c2_152 = arith.constant 2 : index
    %c0_153 = arith.constant 0 : index
    %421 = vector.load %arg5[%c2_152, %c0_153] : memref<50x128xf32, #tpu.memory_space<vmem>>, vector<2x128xf32>
    tpu.vector_store %arg5[%c2_152, %c0_153], %420 {strides = array<i32>} : memref<50x128xf32, #tpu.memory_space<vmem>>, vector<2x128xf32>,
    %c2_154 = arith.constant 2 : index
    %c0_155 = arith.constant 0 : index
    %422 = vector.load %arg6[%c2_154, %c0_155] : memref<50x128xf32, #tpu.memory_space<vmem>>, vector<2x128xf32>
    tpu.vector_store %arg6[%c2_154, %c0_155], %416 {strides = array<i32>} : memref<50x128xf32, #tpu.memory_space<vmem>>, vector<2x128xf32>,
    %423 = vector.extract_strided_slice %387 {offsets = [4, 0], sizes = [2, 128], strides = [1, 1]} : vector<50x128xf32> to vector<2x128xf32>
    %cst_156 = arith.constant 1.000000e+00 : f32
    %424 = vector.broadcast %cst_156 : f32 to vector<2x128xf32>
    %425 = arith.cmpf ogt, %416, %424 : vector<2x128xf32>
    %426 = arith.extui %425 : vector<2x128xi1> to vector<2x128xi32>
    %427 = arith.sitofp %426 : vector<2x128xi32> to vector<2x128xf32>
    %cst_157 = arith.constant 0.949999988 : f32
    %428 = vector.broadcast %cst_157 : f32 to vector<2x128xf32>
    %429 = arith.mulf %428, %416 : vector<2x128xf32>
    %430 = arith.addf %429, %423 : vector<2x128xf32>
    %cst_158 = arith.constant 1.000000e+00 : f32
    %431 = vector.broadcast %cst_158 : f32 to vector<2x128xf32>
    %432 = arith.mulf %427, %431 : vector<2x128xf32>
    %433 = arith.subf %430, %432 : vector<2x128xf32>
    %cst_159 = arith.constant 1.000000e+00 : f32
    %434 = vector.broadcast %cst_159 : f32 to vector<2x128xf32>
    %435 = arith.cmpf ogt, %433, %434 : vector<2x128xf32>
    %436 = arith.extui %435 : vector<2x128xi1> to vector<2x128xi32>
    %437 = arith.sitofp %436 : vector<2x128xi32> to vector<2x128xf32>
    %c4_160 = arith.constant 4 : index
    %c0_161 = arith.constant 0 : index
    %438 = vector.load %arg5[%c4_160, %c0_161] : memref<50x128xf32, #tpu.memory_space<vmem>>, vector<2x128xf32>
    tpu.vector_store %arg5[%c4_160, %c0_161], %437 {strides = array<i32>} : memref<50x128xf32, #tpu.memory_space<vmem>>, vector<2x128xf32>,
    %c4_162 = arith.constant 4 : index
    %c0_163 = arith.constant 0 : index
    %439 = vector.load %arg6[%c4_162, %c0_163] : memref<50x128xf32, #tpu.memory_space<vmem>>, vector<2x128xf32>
    tpu.vector_store %arg6[%c4_162, %c0_163], %433 {strides = array<i32>} : memref<50x128xf32, #tpu.memory_space<vmem>>, vector<2x128xf32>,
    %440 = vector.extract_strided_slice %387 {offsets = [6, 0], sizes = [2, 128], strides = [1, 1]} : vector<50x128xf32> to vector<2x128xf32>
    %cst_164 = arith.constant 1.000000e+00 : f32
    %441 = vector.broadcast %cst_164 : f32 to vector<2x128xf32>
    %442 = arith.cmpf ogt, %433, %441 : vector<2x128xf32>
    %443 = arith.extui %442 : vector<2x128xi1> to vector<2x128xi32>
    %444 = arith.sitofp %443 : vector<2x128xi32> to vector<2x128xf32>
    %cst_165 = arith.constant 0.949999988 : f32
    %445 = vector.broadcast %cst_165 : f32 to vector<2x128xf32>
    %446 = arith.mulf %445, %433 : vector<2x128xf32>
    %447 = arith.addf %446, %440 : vector<2x128xf32>
    %cst_166 = arith.constant 1.000000e+00 : f32
    %448 = vector.broadcast %cst_166 : f32 to vector<2x128xf32>
    %449 = arith.mulf %444, %448 : vector<2x128xf32>
    %450 = arith.subf %447, %449 : vector<2x128xf32>
    %cst_167 = arith.constant 1.000000e+00 : f32
    %451 = vector.broadcast %cst_167 : f32 to vector<2x128xf32>
    %452 = arith.cmpf ogt, %450, %451 : vector<2x128xf32>
    %453 = arith.extui %452 : vector<2x128xi1> to vector<2x128xi32>
    %454 = arith.sitofp %453 : vector<2x128xi32> to vector<2x128xf32>
    %c6_168 = arith.constant 6 : index
    %c0_169 = arith.constant 0 : index
    %455 = vector.load %arg5[%c6_168, %c0_169] : memref<50x128xf32, #tpu.memory_space<vmem>>, vector<2x128xf32>
    tpu.vector_store %arg5[%c6_168, %c0_169], %454 {strides = array<i32>} : memref<50x128xf32, #tpu.memory_space<vmem>>, vector<2x128xf32>,
    %c6_170 = arith.constant 6 : index
    %c0_171 = arith.constant 0 : index
    %456 = vector.load %arg6[%c6_170, %c0_171] : memref<50x128xf32, #tpu.memory_space<vmem>>, vector<2x128xf32>
    tpu.vector_store %arg6[%c6_170, %c0_171], %450 {strides = array<i32>} : memref<50x128xf32, #tpu.memory_space<vmem>>, vector<2x128xf32>,
    %457 = vector.extract_strided_slice %387 {offsets = [8, 0], sizes = [2, 128], strides = [1, 1]} : vector<50x128xf32> to vector<2x128xf32>
    %cst_172 = arith.constant 1.000000e+00 : f32
    %458 = vector.broadcast %cst_172 : f32 to vector<2x128xf32>
    %459 = arith.cmpf ogt, %450, %458 : vector<2x128xf32>
    %460 = arith.extui %459 : vector<2x128xi1> to vector<2x128xi32>
    %461 = arith.sitofp %460 : vector<2x128xi32> to vector<2x128xf32>
    %cst_173 = arith.constant 0.949999988 : f32
    %462 = vector.broadcast %cst_173 : f32 to vector<2x128xf32>
    %463 = arith.mulf %462, %450 : vector<2x128xf32>
    %464 = arith.addf %463, %457 : vector<2x128xf32>
    %cst_174 = arith.constant 1.000000e+00 : f32
    %465 = vector.broadcast %cst_174 : f32 to vector<2x128xf32>
    %466 = arith.mulf %461, %465 : vector<2x128xf32>
    %467 = arith.subf %464, %466 : vector<2x128xf32>
    %cst_175 = arith.constant 1.000000e+00 : f32
    %468 = vector.broadcast %cst_175 : f32 to vector<2x128xf32>
    %469 = arith.cmpf ogt, %467, %468 : vector<2x128xf32>
    %470 = arith.extui %469 : vector<2x128xi1> to vector<2x128xi32>
    %471 = arith.sitofp %470 : vector<2x128xi32> to vector<2x128xf32>
    %c8_176 = arith.constant 8 : index
    %c0_177 = arith.constant 0 : index
    %472 = vector.load %arg5[%c8_176, %c0_177] : memref<50x128xf32, #tpu.memory_space<vmem>>, vector<2x128xf32>
    tpu.vector_store %arg5[%c8_176, %c0_177], %471 {strides = array<i32>} : memref<50x128xf32, #tpu.memory_space<vmem>>, vector<2x128xf32>,
    %c8_178 = arith.constant 8 : index
    %c0_179 = arith.constant 0 : index
    %473 = vector.load %arg6[%c8_178, %c0_179] : memref<50x128xf32, #tpu.memory_space<vmem>>, vector<2x128xf32>
    tpu.vector_store %arg6[%c8_178, %c0_179], %467 {strides = array<i32>} : memref<50x128xf32, #tpu.memory_space<vmem>>, vector<2x128xf32>,
    %474 = vector.extract_strided_slice %387 {offsets = [10, 0], sizes = [2, 128], strides = [1, 1]} : vector<50x128xf32> to vector<2x128xf32>
    %cst_180 = arith.constant 1.000000e+00 : f32
    %475 = vector.broadcast %cst_180 : f32 to vector<2x128xf32>
    %476 = arith.cmpf ogt, %467, %475 : vector<2x128xf32>
    %477 = arith.extui %476 : vector<2x128xi1> to vector<2x128xi32>
    %478 = arith.sitofp %477 : vector<2x128xi32> to vector<2x128xf32>
    %cst_181 = arith.constant 0.949999988 : f32
    %479 = vector.broadcast %cst_181 : f32 to vector<2x128xf32>
    %480 = arith.mulf %479, %467 : vector<2x128xf32>
    %481 = arith.addf %480, %474 : vector<2x128xf32>
    %cst_182 = arith.constant 1.000000e+00 : f32
    %482 = vector.broadcast %cst_182 : f32 to vector<2x128xf32>
    %483 = arith.mulf %478, %482 : vector<2x128xf32>
    %484 = arith.subf %481, %483 : vector<2x128xf32>
    %cst_183 = arith.constant 1.000000e+00 : f32
    %485 = vector.broadcast %cst_183 : f32 to vector<2x128xf32>
    %486 = arith.cmpf ogt, %484, %485 : vector<2x128xf32>
    %487 = arith.extui %486 : vector<2x128xi1> to vector<2x128xi32>
    %488 = arith.sitofp %487 : vector<2x128xi32> to vector<2x128xf32>
    %c10_184 = arith.constant 10 : index
    %c0_185 = arith.constant 0 : index
    %489 = vector.load %arg5[%c10_184, %c0_185] : memref<50x128xf32, #tpu.memory_space<vmem>>, vector<2x128xf32>
    tpu.vector_store %arg5[%c10_184, %c0_185], %488 {strides = array<i32>} : memref<50x128xf32, #tpu.memory_space<vmem>>, vector<2x128xf32>,
    %c10_186 = arith.constant 10 : index
    %c0_187 = arith.constant 0 : index
    %490 = vector.load %arg6[%c10_186, %c0_187] : memref<50x128xf32, #tpu.memory_space<vmem>>, vector<2x128xf32>
    tpu.vector_store %arg6[%c10_186, %c0_187], %484 {strides = array<i32>} : memref<50x128xf32, #tpu.memory_space<vmem>>, vector<2x128xf32>,
    %491 = vector.extract_strided_slice %387 {offsets = [12, 0], sizes = [2, 128], strides = [1, 1]} : vector<50x128xf32> to vector<2x128xf32>
    %cst_188 = arith.constant 1.000000e+00 : f32
    %492 = vector.broadcast %cst_188 : f32 to vector<2x128xf32>
    %493 = arith.cmpf ogt, %484, %492 : vector<2x128xf32>
    %494 = arith.extui %493 : vector<2x128xi1> to vector<2x128xi32>
    %495 = arith.sitofp %494 : vector<2x128xi32> to vector<2x128xf32>
    %cst_189 = arith.constant 0.949999988 : f32
    %496 = vector.broadcast %cst_189 : f32 to vector<2x128xf32>
    %497 = arith.mulf %496, %484 : vector<2x128xf32>
    %498 = arith.addf %497, %491 : vector<2x128xf32>
    %cst_190 = arith.constant 1.000000e+00 : f32
    %499 = vector.broadcast %cst_190 : f32 to vector<2x128xf32>
    %500 = arith.mulf %495, %499 : vector<2x128xf32>
    %501 = arith.subf %498, %500 : vector<2x128xf32>
    %cst_191 = arith.constant 1.000000e+00 : f32
    %502 = vector.broadcast %cst_191 : f32 to vector<2x128xf32>
    %503 = arith.cmpf ogt, %501, %502 : vector<2x128xf32>
    %504 = arith.extui %503 : vector<2x128xi1> to vector<2x128xi32>
    %505 = arith.sitofp %504 : vector<2x128xi32> to vector<2x128xf32>
    %c12_192 = arith.constant 12 : index
    %c0_193 = arith.constant 0 : index
    %506 = vector.load %arg5[%c12_192, %c0_193] : memref<50x128xf32, #tpu.memory_space<vmem>>, vector<2x128xf32>
    tpu.vector_store %arg5[%c12_192, %c0_193], %505 {strides = array<i32>} : memref<50x128xf32, #tpu.memory_space<vmem>>, vector<2x128xf32>,
    %c12_194 = arith.constant 12 : index
    %c0_195 = arith.constant 0 : index
    %507 = vector.load %arg6[%c12_194, %c0_195] : memref<50x128xf32, #tpu.memory_space<vmem>>, vector<2x128xf32>
    tpu.vector_store %arg6[%c12_194, %c0_195], %501 {strides = array<i32>} : memref<50x128xf32, #tpu.memory_space<vmem>>, vector<2x128xf32>,
    %508 = vector.extract_strided_slice %387 {offsets = [14, 0], sizes = [2, 128], strides = [1, 1]} : vector<50x128xf32> to vector<2x128xf32>
    %cst_196 = arith.constant 1.000000e+00 : f32
    %509 = vector.broadcast %cst_196 : f32 to vector<2x128xf32>
    %510 = arith.cmpf ogt, %501, %509 : vector<2x128xf32>
    %511 = arith.extui %510 : vector<2x128xi1> to vector<2x128xi32>
    %512 = arith.sitofp %511 : vector<2x128xi32> to vector<2x128xf32>
    %cst_197 = arith.constant 0.949999988 : f32
    %513 = vector.broadcast %cst_197 : f32 to vector<2x128xf32>
    %514 = arith.mulf %513, %501 : vector<2x128xf32>
    %515 = arith.addf %514, %508 : vector<2x128xf32>
    %cst_198 = arith.constant 1.000000e+00 : f32
    %516 = vector.broadcast %cst_198 : f32 to vector<2x128xf32>
    %517 = arith.mulf %512, %516 : vector<2x128xf32>
    %518 = arith.subf %515, %517 : vector<2x128xf32>
    %cst_199 = arith.constant 1.000000e+00 : f32
    %519 = vector.broadcast %cst_199 : f32 to vector<2x128xf32>
    %520 = arith.cmpf ogt, %518, %519 : vector<2x128xf32>
    %521 = arith.extui %520 : vector<2x128xi1> to vector<2x128xi32>
    %522 = arith.sitofp %521 : vector<2x128xi32> to vector<2x128xf32>
    %c14_200 = arith.constant 14 : index
    %c0_201 = arith.constant 0 : index
    %523 = vector.load %arg5[%c14_200, %c0_201] : memref<50x128xf32, #tpu.memory_space<vmem>>, vector<2x128xf32>
    tpu.vector_store %arg5[%c14_200, %c0_201], %522 {strides = array<i32>} : memref<50x128xf32, #tpu.memory_space<vmem>>, vector<2x128xf32>,
    %c14_202 = arith.constant 14 : index
    %c0_203 = arith.constant 0 : index
    %524 = vector.load %arg6[%c14_202, %c0_203] : memref<50x128xf32, #tpu.memory_space<vmem>>, vector<2x128xf32>
    tpu.vector_store %arg6[%c14_202, %c0_203], %518 {strides = array<i32>} : memref<50x128xf32, #tpu.memory_space<vmem>>, vector<2x128xf32>,
    %525 = vector.extract_strided_slice %387 {offsets = [16, 0], sizes = [2, 128], strides = [1, 1]} : vector<50x128xf32> to vector<2x128xf32>
    %cst_204 = arith.constant 1.000000e+00 : f32
    %526 = vector.broadcast %cst_204 : f32 to vector<2x128xf32>
    %527 = arith.cmpf ogt, %518, %526 : vector<2x128xf32>
    %528 = arith.extui %527 : vector<2x128xi1> to vector<2x128xi32>
    %529 = arith.sitofp %528 : vector<2x128xi32> to vector<2x128xf32>
    %cst_205 = arith.constant 0.949999988 : f32
    %530 = vector.broadcast %cst_205 : f32 to vector<2x128xf32>
    %531 = arith.mulf %530, %518 : vector<2x128xf32>
    %532 = arith.addf %531, %525 : vector<2x128xf32>
    %cst_206 = arith.constant 1.000000e+00 : f32
    %533 = vector.broadcast %cst_206 : f32 to vector<2x128xf32>
    %534 = arith.mulf %529, %533 : vector<2x128xf32>
    %535 = arith.subf %532, %534 : vector<2x128xf32>
    %cst_207 = arith.constant 1.000000e+00 : f32
    %536 = vector.broadcast %cst_207 : f32 to vector<2x128xf32>
    %537 = arith.cmpf ogt, %535, %536 : vector<2x128xf32>
    %538 = arith.extui %537 : vector<2x128xi1> to vector<2x128xi32>
    %539 = arith.sitofp %538 : vector<2x128xi32> to vector<2x128xf32>
    %c16_208 = arith.constant 16 : index
    %c0_209 = arith.constant 0 : index
    %540 = vector.load %arg5[%c16_208, %c0_209] : memref<50x128xf32, #tpu.memory_space<vmem>>, vector<2x128xf32>
    tpu.vector_store %arg5[%c16_208, %c0_209], %539 {strides = array<i32>} : memref<50x128xf32, #tpu.memory_space<vmem>>, vector<2x128xf32>,
    %c16_210 = arith.constant 16 : index
    %c0_211 = arith.constant 0 : index
    %541 = vector.load %arg6[%c16_210, %c0_211] : memref<50x128xf32, #tpu.memory_space<vmem>>, vector<2x128xf32>
    tpu.vector_store %arg6[%c16_210, %c0_211], %535 {strides = array<i32>} : memref<50x128xf32, #tpu.memory_space<vmem>>, vector<2x128xf32>,
    %542 = vector.extract_strided_slice %387 {offsets = [18, 0], sizes = [2, 128], strides = [1, 1]} : vector<50x128xf32> to vector<2x128xf32>
    %cst_212 = arith.constant 1.000000e+00 : f32
    %543 = vector.broadcast %cst_212 : f32 to vector<2x128xf32>
    %544 = arith.cmpf ogt, %535, %543 : vector<2x128xf32>
    %545 = arith.extui %544 : vector<2x128xi1> to vector<2x128xi32>
    %546 = arith.sitofp %545 : vector<2x128xi32> to vector<2x128xf32>
    %cst_213 = arith.constant 0.949999988 : f32
    %547 = vector.broadcast %cst_213 : f32 to vector<2x128xf32>
    %548 = arith.mulf %547, %535 : vector<2x128xf32>
    %549 = arith.addf %548, %542 : vector<2x128xf32>
    %cst_214 = arith.constant 1.000000e+00 : f32
    %550 = vector.broadcast %cst_214 : f32 to vector<2x128xf32>
    %551 = arith.mulf %546, %550 : vector<2x128xf32>
    %552 = arith.subf %549, %551 : vector<2x128xf32>
    %cst_215 = arith.constant 1.000000e+00 : f32
    %553 = vector.broadcast %cst_215 : f32 to vector<2x128xf32>
    %554 = arith.cmpf ogt, %552, %553 : vector<2x128xf32>
    %555 = arith.extui %554 : vector<2x128xi1> to vector<2x128xi32>
    %556 = arith.sitofp %555 : vector<2x128xi32> to vector<2x128xf32>
    %c18_216 = arith.constant 18 : index
    %c0_217 = arith.constant 0 : index
    %557 = vector.load %arg5[%c18_216, %c0_217] : memref<50x128xf32, #tpu.memory_space<vmem>>, vector<2x128xf32>
    tpu.vector_store %arg5[%c18_216, %c0_217], %556 {strides = array<i32>} : memref<50x128xf32, #tpu.memory_space<vmem>>, vector<2x128xf32>,
    %c18_218 = arith.constant 18 : index
    %c0_219 = arith.constant 0 : index
    %558 = vector.load %arg6[%c18_218, %c0_219] : memref<50x128xf32, #tpu.memory_space<vmem>>, vector<2x128xf32>
    tpu.vector_store %arg6[%c18_218, %c0_219], %552 {strides = array<i32>} : memref<50x128xf32, #tpu.memory_space<vmem>>, vector<2x128xf32>,
    %559 = vector.extract_strided_slice %387 {offsets = [20, 0], sizes = [2, 128], strides = [1, 1]} : vector<50x128xf32> to vector<2x128xf32>
    %cst_220 = arith.constant 1.000000e+00 : f32
    %560 = vector.broadcast %cst_220 : f32 to vector<2x128xf32>
    %561 = arith.cmpf ogt, %552, %560 : vector<2x128xf32>
    %562 = arith.extui %561 : vector<2x128xi1> to vector<2x128xi32>
    %563 = arith.sitofp %562 : vector<2x128xi32> to vector<2x128xf32>
    %cst_221 = arith.constant 0.949999988 : f32
    %564 = vector.broadcast %cst_221 : f32 to vector<2x128xf32>
    %565 = arith.mulf %564, %552 : vector<2x128xf32>
    %566 = arith.addf %565, %559 : vector<2x128xf32>
    %cst_222 = arith.constant 1.000000e+00 : f32
    %567 = vector.broadcast %cst_222 : f32 to vector<2x128xf32>
    %568 = arith.mulf %563, %567 : vector<2x128xf32>
    %569 = arith.subf %566, %568 : vector<2x128xf32>
    %cst_223 = arith.constant 1.000000e+00 : f32
    %570 = vector.broadcast %cst_223 : f32 to vector<2x128xf32>
    %571 = arith.cmpf ogt, %569, %570 : vector<2x128xf32>
    %572 = arith.extui %571 : vector<2x128xi1> to vector<2x128xi32>
    %573 = arith.sitofp %572 : vector<2x128xi32> to vector<2x128xf32>
    %c20_224 = arith.constant 20 : index
    %c0_225 = arith.constant 0 : index
    %574 = vector.load %arg5[%c20_224, %c0_225] : memref<50x128xf32, #tpu.memory_space<vmem>>, vector<2x128xf32>
    tpu.vector_store %arg5[%c20_224, %c0_225], %573 {strides = array<i32>} : memref<50x128xf32, #tpu.memory_space<vmem>>, vector<2x128xf32>,
    %c20_226 = arith.constant 20 : index
    %c0_227 = arith.constant 0 : index
    %575 = vector.load %arg6[%c20_226, %c0_227] : memref<50x128xf32, #tpu.memory_space<vmem>>, vector<2x128xf32>
    tpu.vector_store %arg6[%c20_226, %c0_227], %569 {strides = array<i32>} : memref<50x128xf32, #tpu.memory_space<vmem>>, vector<2x128xf32>,
    %576 = vector.extract_strided_slice %387 {offsets = [22, 0], sizes = [2, 128], strides = [1, 1]} : vector<50x128xf32> to vector<2x128xf32>
    %cst_228 = arith.constant 1.000000e+00 : f32
    %577 = vector.broadcast %cst_228 : f32 to vector<2x128xf32>
    %578 = arith.cmpf ogt, %569, %577 : vector<2x128xf32>
    %579 = arith.extui %578 : vector<2x128xi1> to vector<2x128xi32>
    %580 = arith.sitofp %579 : vector<2x128xi32> to vector<2x128xf32>
    %cst_229 = arith.constant 0.949999988 : f32
    %581 = vector.broadcast %cst_229 : f32 to vector<2x128xf32>
    %582 = arith.mulf %581, %569 : vector<2x128xf32>
    %583 = arith.addf %582, %576 : vector<2x128xf32>
    %cst_230 = arith.constant 1.000000e+00 : f32
    %584 = vector.broadcast %cst_230 : f32 to vector<2x128xf32>
    %585 = arith.mulf %580, %584 : vector<2x128xf32>
    %586 = arith.subf %583, %585 : vector<2x128xf32>
    %cst_231 = arith.constant 1.000000e+00 : f32
    %587 = vector.broadcast %cst_231 : f32 to vector<2x128xf32>
    %588 = arith.cmpf ogt, %586, %587 : vector<2x128xf32>
    %589 = arith.extui %588 : vector<2x128xi1> to vector<2x128xi32>
    %590 = arith.sitofp %589 : vector<2x128xi32> to vector<2x128xf32>
    %c22_232 = arith.constant 22 : index
    %c0_233 = arith.constant 0 : index
    %591 = vector.load %arg5[%c22_232, %c0_233] : memref<50x128xf32, #tpu.memory_space<vmem>>, vector<2x128xf32>
    tpu.vector_store %arg5[%c22_232, %c0_233], %590 {strides = array<i32>} : memref<50x128xf32, #tpu.memory_space<vmem>>, vector<2x128xf32>,
    %c22_234 = arith.constant 22 : index
    %c0_235 = arith.constant 0 : index
    %592 = vector.load %arg6[%c22_234, %c0_235] : memref<50x128xf32, #tpu.memory_space<vmem>>, vector<2x128xf32>
    tpu.vector_store %arg6[%c22_234, %c0_235], %586 {strides = array<i32>} : memref<50x128xf32, #tpu.memory_space<vmem>>, vector<2x128xf32>,
    %593 = vector.extract_strided_slice %387 {offsets = [24, 0], sizes = [2, 128], strides = [1, 1]} : vector<50x128xf32> to vector<2x128xf32>
    %cst_236 = arith.constant 1.000000e+00 : f32
    %594 = vector.broadcast %cst_236 : f32 to vector<2x128xf32>
    %595 = arith.cmpf ogt, %586, %594 : vector<2x128xf32>
    %596 = arith.extui %595 : vector<2x128xi1> to vector<2x128xi32>
    %597 = arith.sitofp %596 : vector<2x128xi32> to vector<2x128xf32>
    %cst_237 = arith.constant 0.949999988 : f32
    %598 = vector.broadcast %cst_237 : f32 to vector<2x128xf32>
    %599 = arith.mulf %598, %586 : vector<2x128xf32>
    %600 = arith.addf %599, %593 : vector<2x128xf32>
    %cst_238 = arith.constant 1.000000e+00 : f32
    %601 = vector.broadcast %cst_238 : f32 to vector<2x128xf32>
    %602 = arith.mulf %597, %601 : vector<2x128xf32>
    %603 = arith.subf %600, %602 : vector<2x128xf32>
    %cst_239 = arith.constant 1.000000e+00 : f32
    %604 = vector.broadcast %cst_239 : f32 to vector<2x128xf32>
    %605 = arith.cmpf ogt, %603, %604 : vector<2x128xf32>
    %606 = arith.extui %605 : vector<2x128xi1> to vector<2x128xi32>
    %607 = arith.sitofp %606 : vector<2x128xi32> to vector<2x128xf32>
    %c24_240 = arith.constant 24 : index
    %c0_241 = arith.constant 0 : index
    %608 = vector.load %arg5[%c24_240, %c0_241] : memref<50x128xf32, #tpu.memory_space<vmem>>, vector<2x128xf32>
    tpu.vector_store %arg5[%c24_240, %c0_241], %607 {strides = array<i32>} : memref<50x128xf32, #tpu.memory_space<vmem>>, vector<2x128xf32>,
    %c24_242 = arith.constant 24 : index
    %c0_243 = arith.constant 0 : index
    %609 = vector.load %arg6[%c24_242, %c0_243] : memref<50x128xf32, #tpu.memory_space<vmem>>, vector<2x128xf32>
    tpu.vector_store %arg6[%c24_242, %c0_243], %603 {strides = array<i32>} : memref<50x128xf32, #tpu.memory_space<vmem>>, vector<2x128xf32>,
    %610 = vector.extract_strided_slice %387 {offsets = [26, 0], sizes = [2, 128], strides = [1, 1]} : vector<50x128xf32> to vector<2x128xf32>
    %cst_244 = arith.constant 1.000000e+00 : f32
    %611 = vector.broadcast %cst_244 : f32 to vector<2x128xf32>
    %612 = arith.cmpf ogt, %603, %611 : vector<2x128xf32>
    %613 = arith.extui %612 : vector<2x128xi1> to vector<2x128xi32>
    %614 = arith.sitofp %613 : vector<2x128xi32> to vector<2x128xf32>
    %cst_245 = arith.constant 0.949999988 : f32
    %615 = vector.broadcast %cst_245 : f32 to vector<2x128xf32>
    %616 = arith.mulf %615, %603 : vector<2x128xf32>
    %617 = arith.addf %616, %610 : vector<2x128xf32>
    %cst_246 = arith.constant 1.000000e+00 : f32
    %618 = vector.broadcast %cst_246 : f32 to vector<2x128xf32>
    %619 = arith.mulf %614, %618 : vector<2x128xf32>
    %620 = arith.subf %617, %619 : vector<2x128xf32>
    %cst_247 = arith.constant 1.000000e+00 : f32
    %621 = vector.broadcast %cst_247 : f32 to vector<2x128xf32>
    %622 = arith.cmpf ogt, %620, %621 : vector<2x128xf32>
    %623 = arith.extui %622 : vector<2x128xi1> to vector<2x128xi32>
    %624 = arith.sitofp %623 : vector<2x128xi32> to vector<2x128xf32>
    %c26_248 = arith.constant 26 : index
    %c0_249 = arith.constant 0 : index
    %625 = vector.load %arg5[%c26_248, %c0_249] : memref<50x128xf32, #tpu.memory_space<vmem>>, vector<2x128xf32>
    tpu.vector_store %arg5[%c26_248, %c0_249], %624 {strides = array<i32>} : memref<50x128xf32, #tpu.memory_space<vmem>>, vector<2x128xf32>,
    %c26_250 = arith.constant 26 : index
    %c0_251 = arith.constant 0 : index
    %626 = vector.load %arg6[%c26_250, %c0_251] : memref<50x128xf32, #tpu.memory_space<vmem>>, vector<2x128xf32>
    tpu.vector_store %arg6[%c26_250, %c0_251], %620 {strides = array<i32>} : memref<50x128xf32, #tpu.memory_space<vmem>>, vector<2x128xf32>,
    %627 = vector.extract_strided_slice %387 {offsets = [28, 0], sizes = [2, 128], strides = [1, 1]} : vector<50x128xf32> to vector<2x128xf32>
    %cst_252 = arith.constant 1.000000e+00 : f32
    %628 = vector.broadcast %cst_252 : f32 to vector<2x128xf32>
    %629 = arith.cmpf ogt, %620, %628 : vector<2x128xf32>
    %630 = arith.extui %629 : vector<2x128xi1> to vector<2x128xi32>
    %631 = arith.sitofp %630 : vector<2x128xi32> to vector<2x128xf32>
    %cst_253 = arith.constant 0.949999988 : f32
    %632 = vector.broadcast %cst_253 : f32 to vector<2x128xf32>
    %633 = arith.mulf %632, %620 : vector<2x128xf32>
    %634 = arith.addf %633, %627 : vector<2x128xf32>
    %cst_254 = arith.constant 1.000000e+00 : f32
    %635 = vector.broadcast %cst_254 : f32 to vector<2x128xf32>
    %636 = arith.mulf %631, %635 : vector<2x128xf32>
    %637 = arith.subf %634, %636 : vector<2x128xf32>
    %cst_255 = arith.constant 1.000000e+00 : f32
    %638 = vector.broadcast %cst_255 : f32 to vector<2x128xf32>
    %639 = arith.cmpf ogt, %637, %638 : vector<2x128xf32>
    %640 = arith.extui %639 : vector<2x128xi1> to vector<2x128xi32>
    %641 = arith.sitofp %640 : vector<2x128xi32> to vector<2x128xf32>
    %c28_256 = arith.constant 28 : index
    %c0_257 = arith.constant 0 : index
    %642 = vector.load %arg5[%c28_256, %c0_257] : memref<50x128xf32, #tpu.memory_space<vmem>>, vector<2x128xf32>
    tpu.vector_store %arg5[%c28_256, %c0_257], %641 {strides = array<i32>} : memref<50x128xf32, #tpu.memory_space<vmem>>, vector<2x128xf32>,
    %c28_258 = arith.constant 28 : index
    %c0_259 = arith.constant 0 : index
    %643 = vector.load %arg6[%c28_258, %c0_259] : memref<50x128xf32, #tpu.memory_space<vmem>>, vector<2x128xf32>
    tpu.vector_store %arg6[%c28_258, %c0_259], %637 {strides = array<i32>} : memref<50x128xf32, #tpu.memory_space<vmem>>, vector<2x128xf32>,
    %644 = vector.extract_strided_slice %387 {offsets = [30, 0], sizes = [2, 128], strides = [1, 1]} : vector<50x128xf32> to vector<2x128xf32>
    %cst_260 = arith.constant 1.000000e+00 : f32
    %645 = vector.broadcast %cst_260 : f32 to vector<2x128xf32>
    %646 = arith.cmpf ogt, %637, %645 : vector<2x128xf32>
    %647 = arith.extui %646 : vector<2x128xi1> to vector<2x128xi32>
    %648 = arith.sitofp %647 : vector<2x128xi32> to vector<2x128xf32>
    %cst_261 = arith.constant 0.949999988 : f32
    %649 = vector.broadcast %cst_261 : f32 to vector<2x128xf32>
    %650 = arith.mulf %649, %637 : vector<2x128xf32>
    %651 = arith.addf %650, %644 : vector<2x128xf32>
    %cst_262 = arith.constant 1.000000e+00 : f32
    %652 = vector.broadcast %cst_262 : f32 to vector<2x128xf32>
    %653 = arith.mulf %648, %652 : vector<2x128xf32>
    %654 = arith.subf %651, %653 : vector<2x128xf32>
    %cst_263 = arith.constant 1.000000e+00 : f32
    %655 = vector.broadcast %cst_263 : f32 to vector<2x128xf32>
    %656 = arith.cmpf ogt, %654, %655 : vector<2x128xf32>
    %657 = arith.extui %656 : vector<2x128xi1> to vector<2x128xi32>
    %658 = arith.sitofp %657 : vector<2x128xi32> to vector<2x128xf32>
    %c30_264 = arith.constant 30 : index
    %c0_265 = arith.constant 0 : index
    %659 = vector.load %arg5[%c30_264, %c0_265] : memref<50x128xf32, #tpu.memory_space<vmem>>, vector<2x128xf32>
    tpu.vector_store %arg5[%c30_264, %c0_265], %658 {strides = array<i32>} : memref<50x128xf32, #tpu.memory_space<vmem>>, vector<2x128xf32>,
    %c30_266 = arith.constant 30 : index
    %c0_267 = arith.constant 0 : index
    %660 = vector.load %arg6[%c30_266, %c0_267] : memref<50x128xf32, #tpu.memory_space<vmem>>, vector<2x128xf32>
    tpu.vector_store %arg6[%c30_266, %c0_267], %654 {strides = array<i32>} : memref<50x128xf32, #tpu.memory_space<vmem>>, vector<2x128xf32>,
    %661 = vector.extract_strided_slice %387 {offsets = [32, 0], sizes = [2, 128], strides = [1, 1]} : vector<50x128xf32> to vector<2x128xf32>
    %cst_268 = arith.constant 1.000000e+00 : f32
    %662 = vector.broadcast %cst_268 : f32 to vector<2x128xf32>
    %663 = arith.cmpf ogt, %654, %662 : vector<2x128xf32>
    %664 = arith.extui %663 : vector<2x128xi1> to vector<2x128xi32>
    %665 = arith.sitofp %664 : vector<2x128xi32> to vector<2x128xf32>
    %cst_269 = arith.constant 0.949999988 : f32
    %666 = vector.broadcast %cst_269 : f32 to vector<2x128xf32>
    %667 = arith.mulf %666, %654 : vector<2x128xf32>
    %668 = arith.addf %667, %661 : vector<2x128xf32>
    %cst_270 = arith.constant 1.000000e+00 : f32
    %669 = vector.broadcast %cst_270 : f32 to vector<2x128xf32>
    %670 = arith.mulf %665, %669 : vector<2x128xf32>
    %671 = arith.subf %668, %670 : vector<2x128xf32>
    %cst_271 = arith.constant 1.000000e+00 : f32
    %672 = vector.broadcast %cst_271 : f32 to vector<2x128xf32>
    %673 = arith.cmpf ogt, %671, %672 : vector<2x128xf32>
    %674 = arith.extui %673 : vector<2x128xi1> to vector<2x128xi32>
    %675 = arith.sitofp %674 : vector<2x128xi32> to vector<2x128xf32>
    %c32_272 = arith.constant 32 : index
    %c0_273 = arith.constant 0 : index
    %676 = vector.load %arg5[%c32_272, %c0_273] : memref<50x128xf32, #tpu.memory_space<vmem>>, vector<2x128xf32>
    tpu.vector_store %arg5[%c32_272, %c0_273], %675 {strides = array<i32>} : memref<50x128xf32, #tpu.memory_space<vmem>>, vector<2x128xf32>,
    %c32_274 = arith.constant 32 : index
    %c0_275 = arith.constant 0 : index
    %677 = vector.load %arg6[%c32_274, %c0_275] : memref<50x128xf32, #tpu.memory_space<vmem>>, vector<2x128xf32>
    tpu.vector_store %arg6[%c32_274, %c0_275], %671 {strides = array<i32>} : memref<50x128xf32, #tpu.memory_space<vmem>>, vector<2x128xf32>,
    %678 = vector.extract_strided_slice %387 {offsets = [34, 0], sizes = [2, 128], strides = [1, 1]} : vector<50x128xf32> to vector<2x128xf32>
    %cst_276 = arith.constant 1.000000e+00 : f32
    %679 = vector.broadcast %cst_276 : f32 to vector<2x128xf32>
    %680 = arith.cmpf ogt, %671, %679 : vector<2x128xf32>
    %681 = arith.extui %680 : vector<2x128xi1> to vector<2x128xi32>
    %682 = arith.sitofp %681 : vector<2x128xi32> to vector<2x128xf32>
    %cst_277 = arith.constant 0.949999988 : f32
    %683 = vector.broadcast %cst_277 : f32 to vector<2x128xf32>
    %684 = arith.mulf %683, %671 : vector<2x128xf32>
    %685 = arith.addf %684, %678 : vector<2x128xf32>
    %cst_278 = arith.constant 1.000000e+00 : f32
    %686 = vector.broadcast %cst_278 : f32 to vector<2x128xf32>
    %687 = arith.mulf %682, %686 : vector<2x128xf32>
    %688 = arith.subf %685, %687 : vector<2x128xf32>
    %cst_279 = arith.constant 1.000000e+00 : f32
    %689 = vector.broadcast %cst_279 : f32 to vector<2x128xf32>
    %690 = arith.cmpf ogt, %688, %689 : vector<2x128xf32>
    %691 = arith.extui %690 : vector<2x128xi1> to vector<2x128xi32>
    %692 = arith.sitofp %691 : vector<2x128xi32> to vector<2x128xf32>
    %c34_280 = arith.constant 34 : index
    %c0_281 = arith.constant 0 : index
    %693 = vector.load %arg5[%c34_280, %c0_281] : memref<50x128xf32, #tpu.memory_space<vmem>>, vector<2x128xf32>
    tpu.vector_store %arg5[%c34_280, %c0_281], %692 {strides = array<i32>} : memref<50x128xf32, #tpu.memory_space<vmem>>, vector<2x128xf32>,
    %c34_282 = arith.constant 34 : index
    %c0_283 = arith.constant 0 : index
    %694 = vector.load %arg6[%c34_282, %c0_283] : memref<50x128xf32, #tpu.memory_space<vmem>>, vector<2x128xf32>
    tpu.vector_store %arg6[%c34_282, %c0_283], %688 {strides = array<i32>} : memref<50x128xf32, #tpu.memory_space<vmem>>, vector<2x128xf32>,
    %695 = vector.extract_strided_slice %387 {offsets = [36, 0], sizes = [2, 128], strides = [1, 1]} : vector<50x128xf32> to vector<2x128xf32>
    %cst_284 = arith.constant 1.000000e+00 : f32
    %696 = vector.broadcast %cst_284 : f32 to vector<2x128xf32>
    %697 = arith.cmpf ogt, %688, %696 : vector<2x128xf32>
    %698 = arith.extui %697 : vector<2x128xi1> to vector<2x128xi32>
    %699 = arith.sitofp %698 : vector<2x128xi32> to vector<2x128xf32>
    %cst_285 = arith.constant 0.949999988 : f32
    %700 = vector.broadcast %cst_285 : f32 to vector<2x128xf32>
    %701 = arith.mulf %700, %688 : vector<2x128xf32>
    %702 = arith.addf %701, %695 : vector<2x128xf32>
    %cst_286 = arith.constant 1.000000e+00 : f32
    %703 = vector.broadcast %cst_286 : f32 to vector<2x128xf32>
    %704 = arith.mulf %699, %703 : vector<2x128xf32>
    %705 = arith.subf %702, %704 : vector<2x128xf32>
    %cst_287 = arith.constant 1.000000e+00 : f32
    %706 = vector.broadcast %cst_287 : f32 to vector<2x128xf32>
    %707 = arith.cmpf ogt, %705, %706 : vector<2x128xf32>
    %708 = arith.extui %707 : vector<2x128xi1> to vector<2x128xi32>
    %709 = arith.sitofp %708 : vector<2x128xi32> to vector<2x128xf32>
    %c36_288 = arith.constant 36 : index
    %c0_289 = arith.constant 0 : index
    %710 = vector.load %arg5[%c36_288, %c0_289] : memref<50x128xf32, #tpu.memory_space<vmem>>, vector<2x128xf32>
    tpu.vector_store %arg5[%c36_288, %c0_289], %709 {strides = array<i32>} : memref<50x128xf32, #tpu.memory_space<vmem>>, vector<2x128xf32>,
    %c36_290 = arith.constant 36 : index
    %c0_291 = arith.constant 0 : index
    %711 = vector.load %arg6[%c36_290, %c0_291] : memref<50x128xf32, #tpu.memory_space<vmem>>, vector<2x128xf32>
    tpu.vector_store %arg6[%c36_290, %c0_291], %705 {strides = array<i32>} : memref<50x128xf32, #tpu.memory_space<vmem>>, vector<2x128xf32>,
    %712 = vector.extract_strided_slice %387 {offsets = [38, 0], sizes = [2, 128], strides = [1, 1]} : vector<50x128xf32> to vector<2x128xf32>
    %cst_292 = arith.constant 1.000000e+00 : f32
    %713 = vector.broadcast %cst_292 : f32 to vector<2x128xf32>
    %714 = arith.cmpf ogt, %705, %713 : vector<2x128xf32>
    %715 = arith.extui %714 : vector<2x128xi1> to vector<2x128xi32>
    %716 = arith.sitofp %715 : vector<2x128xi32> to vector<2x128xf32>
    %cst_293 = arith.constant 0.949999988 : f32
    %717 = vector.broadcast %cst_293 : f32 to vector<2x128xf32>
    %718 = arith.mulf %717, %705 : vector<2x128xf32>
    %719 = arith.addf %718, %712 : vector<2x128xf32>
    %cst_294 = arith.constant 1.000000e+00 : f32
    %720 = vector.broadcast %cst_294 : f32 to vector<2x128xf32>
    %721 = arith.mulf %716, %720 : vector<2x128xf32>
    %722 = arith.subf %719, %721 : vector<2x128xf32>
    %cst_295 = arith.constant 1.000000e+00 : f32
    %723 = vector.broadcast %cst_295 : f32 to vector<2x128xf32>
    %724 = arith.cmpf ogt, %722, %723 : vector<2x128xf32>
    %725 = arith.extui %724 : vector<2x128xi1> to vector<2x128xi32>
    %726 = arith.sitofp %725 : vector<2x128xi32> to vector<2x128xf32>
    %c38_296 = arith.constant 38 : index
    %c0_297 = arith.constant 0 : index
    %727 = vector.load %arg5[%c38_296, %c0_297] : memref<50x128xf32, #tpu.memory_space<vmem>>, vector<2x128xf32>
    tpu.vector_store %arg5[%c38_296, %c0_297], %726 {strides = array<i32>} : memref<50x128xf32, #tpu.memory_space<vmem>>, vector<2x128xf32>,
    %c38_298 = arith.constant 38 : index
    %c0_299 = arith.constant 0 : index
    %728 = vector.load %arg6[%c38_298, %c0_299] : memref<50x128xf32, #tpu.memory_space<vmem>>, vector<2x128xf32>
    tpu.vector_store %arg6[%c38_298, %c0_299], %722 {strides = array<i32>} : memref<50x128xf32, #tpu.memory_space<vmem>>, vector<2x128xf32>,
    %729 = vector.extract_strided_slice %387 {offsets = [40, 0], sizes = [2, 128], strides = [1, 1]} : vector<50x128xf32> to vector<2x128xf32>
    %cst_300 = arith.constant 1.000000e+00 : f32
    %730 = vector.broadcast %cst_300 : f32 to vector<2x128xf32>
    %731 = arith.cmpf ogt, %722, %730 : vector<2x128xf32>
    %732 = arith.extui %731 : vector<2x128xi1> to vector<2x128xi32>
    %733 = arith.sitofp %732 : vector<2x128xi32> to vector<2x128xf32>
    %cst_301 = arith.constant 0.949999988 : f32
    %734 = vector.broadcast %cst_301 : f32 to vector<2x128xf32>
    %735 = arith.mulf %734, %722 : vector<2x128xf32>
    %736 = arith.addf %735, %729 : vector<2x128xf32>
    %cst_302 = arith.constant 1.000000e+00 : f32
    %737 = vector.broadcast %cst_302 : f32 to vector<2x128xf32>
    %738 = arith.mulf %733, %737 : vector<2x128xf32>
    %739 = arith.subf %736, %738 : vector<2x128xf32>
    %cst_303 = arith.constant 1.000000e+00 : f32
    %740 = vector.broadcast %cst_303 : f32 to vector<2x128xf32>
    %741 = arith.cmpf ogt, %739, %740 : vector<2x128xf32>
    %742 = arith.extui %741 : vector<2x128xi1> to vector<2x128xi32>
    %743 = arith.sitofp %742 : vector<2x128xi32> to vector<2x128xf32>
    %c40_304 = arith.constant 40 : index
    %c0_305 = arith.constant 0 : index
    %744 = vector.load %arg5[%c40_304, %c0_305] : memref<50x128xf32, #tpu.memory_space<vmem>>, vector<2x128xf32>
    tpu.vector_store %arg5[%c40_304, %c0_305], %743 {strides = array<i32>} : memref<50x128xf32, #tpu.memory_space<vmem>>, vector<2x128xf32>,
    %c40_306 = arith.constant 40 : index
    %c0_307 = arith.constant 0 : index
    %745 = vector.load %arg6[%c40_306, %c0_307] : memref<50x128xf32, #tpu.memory_space<vmem>>, vector<2x128xf32>
    tpu.vector_store %arg6[%c40_306, %c0_307], %739 {strides = array<i32>} : memref<50x128xf32, #tpu.memory_space<vmem>>, vector<2x128xf32>,
    %746 = vector.extract_strided_slice %387 {offsets = [42, 0], sizes = [2, 128], strides = [1, 1]} : vector<50x128xf32> to vector<2x128xf32>
    %cst_308 = arith.constant 1.000000e+00 : f32
    %747 = vector.broadcast %cst_308 : f32 to vector<2x128xf32>
    %748 = arith.cmpf ogt, %739, %747 : vector<2x128xf32>
    %749 = arith.extui %748 : vector<2x128xi1> to vector<2x128xi32>
    %750 = arith.sitofp %749 : vector<2x128xi32> to vector<2x128xf32>
    %cst_309 = arith.constant 0.949999988 : f32
    %751 = vector.broadcast %cst_309 : f32 to vector<2x128xf32>
    %752 = arith.mulf %751, %739 : vector<2x128xf32>
    %753 = arith.addf %752, %746 : vector<2x128xf32>
    %cst_310 = arith.constant 1.000000e+00 : f32
    %754 = vector.broadcast %cst_310 : f32 to vector<2x128xf32>
    %755 = arith.mulf %750, %754 : vector<2x128xf32>
    %756 = arith.subf %753, %755 : vector<2x128xf32>
    %cst_311 = arith.constant 1.000000e+00 : f32
    %757 = vector.broadcast %cst_311 : f32 to vector<2x128xf32>
    %758 = arith.cmpf ogt, %756, %757 : vector<2x128xf32>
    %759 = arith.extui %758 : vector<2x128xi1> to vector<2x128xi32>
    %760 = arith.sitofp %759 : vector<2x128xi32> to vector<2x128xf32>
    %c42_312 = arith.constant 42 : index
    %c0_313 = arith.constant 0 : index
    %761 = vector.load %arg5[%c42_312, %c0_313] : memref<50x128xf32, #tpu.memory_space<vmem>>, vector<2x128xf32>
    tpu.vector_store %arg5[%c42_312, %c0_313], %760 {strides = array<i32>} : memref<50x128xf32, #tpu.memory_space<vmem>>, vector<2x128xf32>,
    %c42_314 = arith.constant 42 : index
    %c0_315 = arith.constant 0 : index
    %762 = vector.load %arg6[%c42_314, %c0_315] : memref<50x128xf32, #tpu.memory_space<vmem>>, vector<2x128xf32>
    tpu.vector_store %arg6[%c42_314, %c0_315], %756 {strides = array<i32>} : memref<50x128xf32, #tpu.memory_space<vmem>>, vector<2x128xf32>,
    %763 = vector.extract_strided_slice %387 {offsets = [44, 0], sizes = [2, 128], strides = [1, 1]} : vector<50x128xf32> to vector<2x128xf32>
    %cst_316 = arith.constant 1.000000e+00 : f32
    %764 = vector.broadcast %cst_316 : f32 to vector<2x128xf32>
    %765 = arith.cmpf ogt, %756, %764 : vector<2x128xf32>
    %766 = arith.extui %765 : vector<2x128xi1> to vector<2x128xi32>
    %767 = arith.sitofp %766 : vector<2x128xi32> to vector<2x128xf32>
    %cst_317 = arith.constant 0.949999988 : f32
    %768 = vector.broadcast %cst_317 : f32 to vector<2x128xf32>
    %769 = arith.mulf %768, %756 : vector<2x128xf32>
    %770 = arith.addf %769, %763 : vector<2x128xf32>
    %cst_318 = arith.constant 1.000000e+00 : f32
    %771 = vector.broadcast %cst_318 : f32 to vector<2x128xf32>
    %772 = arith.mulf %767, %771 : vector<2x128xf32>
    %773 = arith.subf %770, %772 : vector<2x128xf32>
    %cst_319 = arith.constant 1.000000e+00 : f32
    %774 = vector.broadcast %cst_319 : f32 to vector<2x128xf32>
    %775 = arith.cmpf ogt, %773, %774 : vector<2x128xf32>
    %776 = arith.extui %775 : vector<2x128xi1> to vector<2x128xi32>
    %777 = arith.sitofp %776 : vector<2x128xi32> to vector<2x128xf32>
    %c44_320 = arith.constant 44 : index
    %c0_321 = arith.constant 0 : index
    %778 = vector.load %arg5[%c44_320, %c0_321] : memref<50x128xf32, #tpu.memory_space<vmem>>, vector<2x128xf32>
    tpu.vector_store %arg5[%c44_320, %c0_321], %777 {strides = array<i32>} : memref<50x128xf32, #tpu.memory_space<vmem>>, vector<2x128xf32>,
    %c44_322 = arith.constant 44 : index
    %c0_323 = arith.constant 0 : index
    %779 = vector.load %arg6[%c44_322, %c0_323] : memref<50x128xf32, #tpu.memory_space<vmem>>, vector<2x128xf32>
    tpu.vector_store %arg6[%c44_322, %c0_323], %773 {strides = array<i32>} : memref<50x128xf32, #tpu.memory_space<vmem>>, vector<2x128xf32>,
    %780 = vector.extract_strided_slice %387 {offsets = [46, 0], sizes = [2, 128], strides = [1, 1]} : vector<50x128xf32> to vector<2x128xf32>
    %cst_324 = arith.constant 1.000000e+00 : f32
    %781 = vector.broadcast %cst_324 : f32 to vector<2x128xf32>
    %782 = arith.cmpf ogt, %773, %781 : vector<2x128xf32>
    %783 = arith.extui %782 : vector<2x128xi1> to vector<2x128xi32>
    %784 = arith.sitofp %783 : vector<2x128xi32> to vector<2x128xf32>
    %cst_325 = arith.constant 0.949999988 : f32
    %785 = vector.broadcast %cst_325 : f32 to vector<2x128xf32>
    %786 = arith.mulf %785, %773 : vector<2x128xf32>
    %787 = arith.addf %786, %780 : vector<2x128xf32>
    %cst_326 = arith.constant 1.000000e+00 : f32
    %788 = vector.broadcast %cst_326 : f32 to vector<2x128xf32>
    %789 = arith.mulf %784, %788 : vector<2x128xf32>
    %790 = arith.subf %787, %789 : vector<2x128xf32>
    %cst_327 = arith.constant 1.000000e+00 : f32
    %791 = vector.broadcast %cst_327 : f32 to vector<2x128xf32>
    %792 = arith.cmpf ogt, %790, %791 : vector<2x128xf32>
    %793 = arith.extui %792 : vector<2x128xi1> to vector<2x128xi32>
    %794 = arith.sitofp %793 : vector<2x128xi32> to vector<2x128xf32>
    %c46_328 = arith.constant 46 : index
    %c0_329 = arith.constant 0 : index
    %795 = vector.load %arg5[%c46_328, %c0_329] : memref<50x128xf32, #tpu.memory_space<vmem>>, vector<2x128xf32>
    tpu.vector_store %arg5[%c46_328, %c0_329], %794 {strides = array<i32>} : memref<50x128xf32, #tpu.memory_space<vmem>>, vector<2x128xf32>,
    %c46_330 = arith.constant 46 : index
    %c0_331 = arith.constant 0 : index
    %796 = vector.load %arg6[%c46_330, %c0_331] : memref<50x128xf32, #tpu.memory_space<vmem>>, vector<2x128xf32>
    tpu.vector_store %arg6[%c46_330, %c0_331], %790 {strides = array<i32>} : memref<50x128xf32, #tpu.memory_space<vmem>>, vector<2x128xf32>,
    %797 = vector.extract_strided_slice %387 {offsets = [48, 0], sizes = [2, 128], strides = [1, 1]} : vector<50x128xf32> to vector<2x128xf32>
    %cst_332 = arith.constant 1.000000e+00 : f32
    %798 = vector.broadcast %cst_332 : f32 to vector<2x128xf32>
    %799 = arith.cmpf ogt, %790, %798 : vector<2x128xf32>
    %800 = arith.extui %799 : vector<2x128xi1> to vector<2x128xi32>
    %801 = arith.sitofp %800 : vector<2x128xi32> to vector<2x128xf32>
    %cst_333 = arith.constant 0.949999988 : f32
    %802 = vector.broadcast %cst_333 : f32 to vector<2x128xf32>
    %803 = arith.mulf %802, %790 : vector<2x128xf32>
    %804 = arith.addf %803, %797 : vector<2x128xf32>
    %cst_334 = arith.constant 1.000000e+00 : f32
    %805 = vector.broadcast %cst_334 : f32 to vector<2x128xf32>
    %806 = arith.mulf %801, %805 : vector<2x128xf32>
    %807 = arith.subf %804, %806 : vector<2x128xf32>
    %cst_335 = arith.constant 1.000000e+00 : f32
    %808 = vector.broadcast %cst_335 : f32 to vector<2x128xf32>
    %809 = arith.cmpf ogt, %807, %808 : vector<2x128xf32>
    %810 = arith.extui %809 : vector<2x128xi1> to vector<2x128xi32>
    %811 = arith.sitofp %810 : vector<2x128xi32> to vector<2x128xf32>
    %c48_336 = arith.constant 48 : index
    %c0_337 = arith.constant 0 : index
    %812 = vector.load %arg5[%c48_336, %c0_337] : memref<50x128xf32, #tpu.memory_space<vmem>>, vector<2x128xf32>
    tpu.vector_store %arg5[%c48_336, %c0_337], %811 {strides = array<i32>} : memref<50x128xf32, #tpu.memory_space<vmem>>, vector<2x128xf32>,
    %c48_338 = arith.constant 48 : index
    %c0_339 = arith.constant 0 : index
    %813 = vector.load %arg6[%c48_338, %c0_339] : memref<50x128xf32, #tpu.memory_space<vmem>>, vector<2x128xf32>
    tpu.vector_store %arg6[%c48_338, %c0_339], %807 {strides = array<i32>} : memref<50x128xf32, #tpu.memory_space<vmem>>, vector<2x128xf32>,
    return
  }
}

</mosaic_0001>

<bundles_post_ra>
// kernel: snn_forward.1
= control target key start
LH: loop header
LB: loop body
LE: loop exit
PB: predicated region body
PF: predicated region fallthrough
CT: control target
= control target key end

     0   :  { %12 = vsyncpa [#allocation4], 0  ;;  %s1868_s0 = inlined_call_operand.hbm [shape: f32[2,784], index: 0, kind: input, shape index: {}]   ;;  %s1869_s1 = inlined_call_operand.hbm [shape: f32[784,128], index: 1, kind: input, shape index: {}]   ;;  %s1870_s2 = inlined_call_operand.vmem [shape: f32[1,128], index: 2, kind: input, shape index: {}]   ;;  %s1871_s3 = inlined_call_operand.hbm [shape: f32[128,128], index: 3, kind: input, shape index: {}]   ;;  %s1872_s4 = inlined_call_operand.vmem [shape: f32[1,128], index: 4, kind: input, shape index: {}]   ;;  %s1873_s5 = inlined_call_operand.vmem [shape: f32[50,128], index: 5, kind: output, shape index: {0}]   ;;  %s1874_s6 = inlined_call_operand.vmem [shape: f32[50,128], index: 6, kind: output, shape index: {1}]  }
   0x1   :  { %13 = vsyncpa [#allocation6], 0  ;;  %s1498_s21 = smov [#allocation5]   ;;  %s1428_s25 = scalar_lea.hbm %s1869_s1, 12544 }
   0x2   :  { %s29_s22 = sshll.u32 %s1498_s21, 4  ;;  %p1429_p0 = scmp.ne.s32.totalorder %s1869_s1, %s1428_s25  ;;  %s30_s22 = int_to_ptr.vmem [resolvable:$true] %s29_s22 }
   0x3   :  { %p1432_p1 = scmp.lt.u32.totalorder %s1428_s25, %s1869_s1 }
   0x5   :  { %p1434_p2 = pnand %p1432_p1, %p1429_p0 }
   0x7   :  { %1437 = shalt.err (!%p1434_p2)
}
   0x8   :  { %s1438_s30 = scalar_lea.vmem %s30_s22, 12544  ;;  %p1443_p4 = scmp.lt.s32.totalorder %s30_s22, %s30_s22 }
   0x9   :  { %p1439_p3 = scmp.ne.s32.totalorder %s30_s22, %s1438_s30  ;;  %p1444_p5 = scmp.lt.s32.totalorder %s1438_s30, %s1438_s30 }
   0xb   :  { %p1445_p6 = por %p1444_p5, %p1443_p4 }
   0xd   :  { %p1446_p7 = pnand %p1445_p6, %p1439_p3 }
   0xf   :  { %1449 = shalt.err (!%p1446_p7)
}
  0x10   :  { %s1499_s7 = smov 128   ;;  %s1500_s8 = smov 8  }
  0x11   :  { %35 = dma.hbm_to_vmem [thread:$0]  %s1869_s1, 12544, %s30_s22, [#allocation6], %s1499_s7, %s1499_s7, %s1500_s8  }
  0x12   :  { %s1501_s11 = smov [#allocation3]   ;;  %s1502_s13 = smov [#allocation7]  }
  0x13   :  { %s20_s12 = sshll.u32 %s1501_s11, 4  ;;  %s43_s14 = sshll.u32 %s1502_s13, 4  ;;  %s21_s12 = int_to_ptr.vmem [resolvable:$true] %s20_s12  ;;  %s44_s14 = int_to_ptr.vmem [resolvable:$true] %s43_s14 }
  0x14   :  { %s1450_s17 = scalar_lea.hbm %s1868_s0, 224 }
  0x15   :  { %p1451_p8 = scmp.ne.s32.totalorder %s1868_s0, %s1450_s17  ;;  %p1454_p9 = scmp.lt.u32.totalorder %s1450_s17, %s1868_s0 }
  0x17   :  { %p1456_p10 = pnand %p1454_p9, %p1451_p8 }
  0x19   :  { %1459 = shalt.err (!%p1456_p10)
}
  0x1a   :  { %s1460_s1 = scalar_lea.vmem %s21_s12, 224  ;;  %p1465_p12 = scmp.lt.s32.totalorder %s21_s12, %s21_s12 }
  0x1b   :  { %p1461_p11 = scmp.ne.s32.totalorder %s21_s12, %s1460_s1  ;;  %p1466_p13 = scmp.lt.s32.totalorder %s1460_s1, %s1460_s1 }
  0x1d   :  { %p1467_p0 = por %p1466_p13, %p1465_p12 }
  0x1f   :  { %p1468_p1 = pnand %p1467_p0, %p1461_p11 }
  0x21   :  { %1471 = shalt.err (!%p1468_p1)
}
  0x22   :  { %23 = dma.hbm_to_vmem [thread:$0]  %s1868_s0, 224, %s21_s12, [#allocation4]  }
  0x23   :  { %s1472_s26 = scalar_lea.hbm %s1871_s3, 2048 }
  0x24   :  { %p1473_p2 = scmp.ne.s32.totalorder %s1871_s3, %s1472_s26  ;;  %p1476_p3 = scmp.lt.u32.totalorder %s1472_s26, %s1871_s3 }
  0x26   :  { %p1478_p4 = pnand %p1476_p3, %p1473_p2 }
  0x28   :  { %1481 = shalt.err (!%p1478_p4)
}
  0x29   :  { %s1482_s9 = scalar_lea.vmem %s44_s14, 2048  ;;  %p1487_p6 = scmp.lt.s32.totalorder %s44_s14, %s44_s14 }
  0x2a   :  { %p1483_p5 = scmp.ne.s32.totalorder %s44_s14, %s1482_s9  ;;  %p1488_p7 = scmp.lt.s32.totalorder %s1482_s9, %s1482_s9 }
  0x2c   :  { %p1489_p8 = por %p1488_p7, %p1487_p6 }
  0x2e   :  { %p1490_p9 = pnand %p1489_p8, %p1483_p5 }
  0x30   :  { %1493 = shalt.err (!%p1490_p9)
}
  0x31   :  { %49 = dma.hbm_to_vmem [thread:$0]  %s1871_s3, 2048, %s44_s14, [#allocation6], %s1499_s7, %s1499_s7, %s1500_s8  }
  0x32   :  { %1494 = dma.done.wait [#allocation4], 224  }
  0x33   :  { %1495 = vsyncadd [#allocation4], 4294967072 }
  0x34   :  { %1496 = dma.done.wait [#allocation6], 14592  }
  0x35   :  { %1497 = vsyncadd [#allocation6], 4294952704  ;;  %v79_v0 = vld [vmem:[#allocation5 + $0x80] sm:$0xff]  ;;  %v80_v1 = vld [vmem:[#allocation5 + $0x88] sm:$0xff]  ;;  %v1503_v43 = vmov 1983009808   ;;  %v174_v45 = vlaneseq }
  0x36   :  { %v63_v2 = vld [vmem:[#allocation5] sm:$0xff]  ;;  %v1294_v3 = vpack.c.bf16 %v80_v1, %v79_v0  ;;  %v64_v4 = vld [vmem:[#allocation5 + $0x8] sm:$0xff]  ;;  %v81_v11 = vld [vmem:[#allocation5 + $0x90] sm:$0xff]  ;;  %v172_v44 = vunpack.c.l.s4 %v1503_v43  ;;  %vm1505_vm0 = vmmov 0   ;;  %vm209_vm1 = vcmask 130048  }
  0x37   :  { %v111_v5 = vld [vmem:[#allocation5 + $0x180] sm:$0xff]  ;;  %v112_v6 = vld [vmem:[#allocation5 + $0x188] sm:$0xff]  ;;  %v1296_v7 = vpack.c.bf16 %v64_v4, %v63_v2  ;;  %v82_v13 = vld [vmem:[#allocation5 + $0x98] sm:$0xff]  ;;  %v175_v60 = vshrl.u32 %v174_v45, 7 }
  0x38   :  { %v1326_v8 = vpack.c.bf16 %v112_v6, %v111_v5  ;;  %v95_v9 = vld [vmem:[#allocation5 + $0x100] sm:$0xff]  ;;  %v96_v10 = vld [vmem:[#allocation5 + $0x108] sm:$0xff]  ;;  %1295 = vmatprep.subr.bf16.mxu0 %v1294_v3  ;;  %v65_v14 = vld [vmem:[#allocation5 + $0x10] sm:$0xff]  ;;  %v1298_v16 = vpack.c.bf16 %v82_v13, %v81_v11  ;;  %v173_v59 = vunpack.c.0.s8 %v172_v44 }
  0x39   :  { %v1328_v12 = vpack.c.bf16 %v96_v10, %v95_v9  ;;  %v66_v15 = vld [vmem:[#allocation5 + $0x18] sm:$0xff]  ;;  %1297 = vmatpush3.bf16.msra.mxu0 %v1296_v7  ;;  %v113_v18 = vld [vmem:[#allocation5 + $0x190] sm:$0xff]  ;;  %v83_v23 = vld [vmem:[#allocation5 + $0xa0] sm:$0xff] }
  0x3a   :  { %1327 = vmatprep.subr.bf16.mxu1 %v1326_v8  ;;  %v1300_v17 = vpack.c.bf16 %v66_v15, %v65_v14  ;;  %v114_v19 = vld [vmem:[#allocation5 + $0x198] sm:$0xff]  ;;  %v97_v20 = vld [vmem:[#allocation5 + $0x110] sm:$0xff]  ;;  %v84_v24 = vld [vmem:[#allocation5 + $0xa8] sm:$0xff]  ;;  %1299 = vmatprep.subr.bf16.mxu0 %v1298_v16  ;;  %v1584_v10 = vsub.s32 %v173_v59, %v175_v60  ;;  %v1504_v59 = vmov 0.0|0.0  }
  0x3b   :  { %1329 = vmatpush3.bf16.msra.mxu1 %v1328_v12  ;;  %v1330_v21 = vpack.c.bf16 %v114_v19, %v113_v18  ;;  %v98_v22 = vld [vmem:[#allocation5 + $0x118] sm:$0xff]  ;;  %v1302_v26 = vpack.c.bf16 %v84_v24, %v83_v23  ;;  %v67_v27 = vld [vmem:[#allocation5 + $0x20] sm:$0xff]  ;;  %v68_v28 = vld [vmem:[#allocation5 + $0x28] sm:$0xff] }
  0x3c   :  { %v1332_v25 = vpack.c.bf16 %v98_v22, %v97_v20  ;;  %v115_v29 = vld [vmem:[#allocation5 + $0x1a0] sm:$0xff]  ;;  %v116_v30 = vld [vmem:[#allocation5 + $0x1a8] sm:$0xff]  ;;  %v1304_v33 = vpack.c.bf16 %v68_v28, %v67_v27  ;;  %v85_v35 = vld [vmem:[#allocation5 + $0xb0] sm:$0xff] }
  0x3d   :  { %1331 = vmatprep.subr.bf16.mxu1 %v1330_v21  ;;  %v99_v31 = vld [vmem:[#allocation5 + $0x120] sm:$0xff]  ;;  %v100_v32 = vld [vmem:[#allocation5 + $0x128] sm:$0xff]  ;;  %1301 = vmatpush3.bf16.msra.mxu0 %v1300_v17  ;;  %v1334_v34 = vpack.c.bf16 %v116_v30, %v115_v29  ;;  %v86_v36 = vld [vmem:[#allocation5 + $0xb8] sm:$0xff] }
  0x3e   :  { %v69_v37 = vld [vmem:[#allocation5 + $0x30] sm:$0xff]  ;;  %1303 = vmatprep.subr.bf16.mxu0 %v1302_v26  ;;  %v1336_v38 = vpack.c.bf16 %v100_v32, %v99_v31  ;;  %v1306_v39 = vpack.c.bf16 %v86_v36, %v85_v35  ;;  %v70_v40 = vld [vmem:[#allocation5 + $0x38] sm:$0xff]  ;;  %v87_v49 = vld [vmem:[#allocation5 + $0xc0] sm:$0xff] }
  0x3f   :  { %1333 = vmatpush3.bf16.msra.mxu1 %v1332_v25  ;;  %v117_v41 = vld [vmem:[#allocation5 + $0x1b0] sm:$0xff]  ;;  %v118_v42 = vld [vmem:[#allocation5 + $0x1b8] sm:$0xff]  ;;  %v88_v50 = vld [vmem:[#allocation5 + $0xc8] sm:$0xff]  ;;  %v1308_v51 = vpack.c.bf16 %v70_v40, %v69_v37 }
  0x40   :  { %1335 = vmatprep.subr.bf16.mxu1 %v1334_v34  ;;  %v1338_v46 = vpack.c.bf16 %v118_v42, %v117_v41  ;;  %v101_v47 = vld [vmem:[#allocation5 + $0x130] sm:$0xff]  ;;  %v102_v48 = vld [vmem:[#allocation5 + $0x138] sm:$0xff]  ;;  %v119_v52 = vld [vmem:[#allocation5 + $0x1c0] sm:$0xff]  ;;  %v1310_v55 = vpack.c.bf16 %v88_v50, %v87_v49 }
  0x41   :  { %1305 = vmatpush3.bf16.msra.mxu0 %v1304_v33  ;;  %v120_v53 = vld [vmem:[#allocation5 + $0x1c8] sm:$0xff]  ;;  %v1340_v54 = vpack.c.bf16 %v102_v48, %v101_v47  ;;  %v71_v56 = vld [vmem:[#allocation5 + $0x40] sm:$0xff]  ;;  %v89_v63 = vld [vmem:[#allocation5 + $0xd0] sm:$0xff] }
  0x42   :  { %1307 = vmatprep.subr.bf16.mxu0 %v1306_v39  ;;  %v72_v57 = vld [vmem:[#allocation5 + $0x48] sm:$0xff]  ;;  %v103_v58 = vld [vmem:[#allocation5 + $0x140] sm:$0xff]  ;;  %v1342_v61 = vpack.c.bf16 %v120_v53, %v119_v52  ;;  %v90_v0 = vld [vmem:[#allocation5 + $0xd8] sm:$0xff] }
  0x43   :  { %1337 = vmatpush3.bf16.msra.mxu1 %v1336_v38  ;;  %v104_v62 = vld [vmem:[#allocation5 + $0x148] sm:$0xff]  ;;  %v121_v1 = vld [vmem:[#allocation5 + $0x1d0] sm:$0xff]  ;;  %v122_v2 = vld [vmem:[#allocation5 + $0x1d8] sm:$0xff]  ;;  %v1312_v3 = vpack.c.bf16 %v72_v57, %v71_v56  ;;  %v1314_v6 = vpack.c.bf16 %v90_v0, %v89_v63 }
  0x44   :  { %1339 = vmatprep.subr.bf16.mxu1 %v1338_v46  ;;  %v73_v4 = vld [vmem:[#allocation5 + $0x50] sm:$0xff]  ;;  %v1344_v5 = vpack.c.bf16 %v104_v62, %v103_v58  ;;  %v74_v7 = vld [vmem:[#allocation5 + $0x58] sm:$0xff]  ;;  %v1346_v11 = vpack.c.bf16 %v122_v2, %v121_v1  ;;  %v91_v12 = vld [vmem:[#allocation5 + $0xe0] sm:$0xff] }
  0x45   :  { %1309 = vmatpush3.bf16.msra.mxu0 %v1308_v51  ;;  %v105_v8 = vld [vmem:[#allocation5 + $0x150] sm:$0xff]  ;;  %v106_v9 = vld [vmem:[#allocation5 + $0x158] sm:$0xff]  ;;  %v92_v13 = vld [vmem:[#allocation5 + $0xe8] sm:$0xff]  ;;  %v1316_v16 = vpack.c.bf16 %v74_v7, %v73_v4 }
  0x46   :  { %1311 = vmatprep.subr.bf16.mxu0 %v1310_v55  ;;  %v123_v14 = vld [vmem:[#allocation5 + $0x1e0] sm:$0xff]  ;;  %v124_v15 = vld [vmem:[#allocation5 + $0x1e8] sm:$0xff]  ;;  %v1348_v17 = vpack.c.bf16 %v106_v9, %v105_v8  ;;  %v61_v18 = vld [vmem:[#allocation3] sm:$0xff]  ;;  %v1318_v19 = vpack.c.bf16 %v92_v13, %v91_v12 }
  0x47   :  { %1341 = vmatpush3.bf16.msra.mxu1 %v1340_v54  ;;  %v75_v20 = vld [vmem:[#allocation5 + $0x60] sm:$0xff]  ;;  %v76_v21 = vld [vmem:[#allocation5 + $0x68] sm:$0xff]  ;;  %v177_v23 = vrot.slane %v61_v18, %v1584_v10  ;;  %v170_v24 = vcombine.high %v61_v18, %v61_v18  ;;  %v1350_v25 = vpack.c.bf16 %v124_v15, %v123_v14  ;;  %v93_v27 = vld [vmem:[#allocation5 + $0xf0] sm:$0xff] }
  0x48   :  { %1343 = vmatprep.subr.bf16.mxu1 %v1342_v61  ;;  %v107_v22 = vld [vmem:[#allocation5 + $0x160] sm:$0xff]  ;;  %v108_v26 = vld [vmem:[#allocation5 + $0x168] sm:$0xff]  ;;  %v94_v28 = vld [vmem:[#allocation5 + $0xf8] sm:$0xff]  ;;  %v1320_v33 = vpack.c.bf16 %v76_v21, %v75_v20 }
  0x49   :  { %1313 = vmatpush3.bf16.msra.mxu0 %v1312_v3  ;;  %v125_v29 = vld [vmem:[#allocation5 + $0x1f0] sm:$0xff]  ;;  %v126_v30 = vld [vmem:[#allocation5 + $0x1f8] sm:$0xff]  ;;  %v185_v31 = vcombine.high %v177_v23, %v177_v23  ;;  %v184_v32 = vrot.slane %v170_v24, %v1584_v10  ;;  %v1352_v34 = vpack.c.bf16 %v108_v26, %v107_v22  ;;  %v1322_v35 = vpack.c.bf16 %v94_v28, %v93_v27  ;;  %v143_v42 = vld [vmem:[#allocation5 + $0x280] sm:$0xff] }
  0x4a   :  { %1315 = vmatprep.subr.bf16.mxu0 %v1314_v6  ;;  %v77_v36 = vld [vmem:[#allocation5 + $0x70] sm:$0xff]  ;;  %v78_v37 = vld [vmem:[#allocation5 + $0x78] sm:$0xff]  ;;  %v1354_v40 = vpack.c.bf16 %v126_v30, %v125_v29  ;;  %v144_v43 = vld [vmem:[#allocation5 + $0x288] sm:$0xff]  ;;  %v1506_v3 = vmov 0.0  }
  0x4b   :  { %1345 = vmatpush3.bf16.msra.mxu1 %v1344_v5  ;;  %v109_v38 = vld [vmem:[#allocation5 + $0x170] sm:$0xff]  ;;  %v186_v39 = vcombine.high %v184_v32, %v184_v32  ;;  %276 = vmatprep.mubr.f32.mxu0 %v185_v31  ;;  %v110_v41 = vld [vmem:[#allocation5 + $0x178] sm:$0xff]  ;;  %v1324_v44 = vpack.c.bf16 %v78_v37, %v77_v36  ;;  %v1358_v46 = vpack.c.bf16 %v144_v43, %v143_v42  ;;  %v127_v47 = vld [vmem:[#allocation5 + $0x200] sm:$0xff] }
  0x4c   :  { %1347 = vmatprep.subr.bf16.mxu1 %v1346_v11  ;;  %v1356_v45 = vpack.c.bf16 %v110_v41, %v109_v38  ;;  %v128_v48 = vld [vmem:[#allocation5 + $0x208] sm:$0xff]  ;;  %v145_v49 = vld [vmem:[#allocation5 + $0x290] sm:$0xff]  ;;  %v146_v50 = vld [vmem:[#allocation5 + $0x298] sm:$0xff] }
  0x4d   :  { %1317 = vmatpush3.bf16.msra.mxu0 %v1316_v16  ;;  %346 = vmatprep.mubr.f32.mxu1 %v186_v39  ;;  %v1360_v51 = vpack.c.bf16 %v128_v48, %v127_v47  ;;  %v1588_v52 = vld [vmem:[#allocation3 + $0x8] sm:$0x3f]  ;;  %v1362_v53 = vpack.c.bf16 %v146_v50, %v145_v49  ;;  %v129_v54 = vld [vmem:[#allocation5 + $0x210] sm:$0xff]  ;;  %v147_v57 = vld [vmem:[#allocation5 + $0x2a0] sm:$0xff] }
  0x4e   :  { %1319 = vmatprep.subr.bf16.mxu0 %v1318_v19  ;;  %v130_v55 = vld [vmem:[#allocation5 + $0x218] sm:$0xff]  ;;  %v1592_v56 = vrot.slane %v1588_v52, %v1584_v10  ;;  %v148_v58 = vld [vmem:[#allocation5 + $0x2a8] sm:$0xff]  ;;  %v131_v63 = vld [vmem:[#allocation5 + $0x220] sm:$0xff]  ;;  %v187_v36 = vcombine.high %v1588_v52, %v1588_v52 }
  0x4f   :  { %1349 = vmatpush3.bf16.msra.mxu1 %v1348_v17  ;;  %v1364_v61 = vpack.c.bf16 %v130_v55, %v129_v54  ;;  %v1366_v62 = vpack.c.bf16 %v148_v58, %v147_v57  ;;  %v132_v0 = vld [vmem:[#allocation5 + $0x228] sm:$0xff]  ;;  %v149_v1 = vld [vmem:[#allocation5 + $0x2b0] sm:$0xff]  ;;  %v150_v2 = vld [vmem:[#allocation5 + $0x2b8] sm:$0xff] }
  0x50   :  { %1351 = vmatprep.subr.bf16.mxu1 %v1350_v25  ;;  %v202_v60 = vcombine.high %v1592_v56, %v1592_v56  ;;  %v1368_v4 = vpack.c.bf16 %v132_v0, %v131_v63  ;;  %v1370_v5 = vpack.c.bf16 %v150_v2, %v149_v1  ;;  %v133_v6 = vld [vmem:[#allocation5 + $0x230] sm:$0xff]  ;;  %v134_v7 = vld [vmem:[#allocation5 + $0x238] sm:$0xff]  ;;  %v151_v8 = vld [vmem:[#allocation5 + $0x2c0] sm:$0xff]  ;;  %v201_v38 = vrot.slane %v187_v36, %v1584_v10 }
  0x51   :  { %1321 = vmatpush3.bf16.msra.mxu0 %v1320_v33  ;;  %v152_v9 = vld [vmem:[#allocation5 + $0x2c8] sm:$0xff]  ;;  %v1372_v11 = vpack.c.bf16 %v134_v7, %v133_v6  ;;  %v135_v13 = vld [vmem:[#allocation5 + $0x240] sm:$0xff]  ;;  %v153_v15 = vld [vmem:[#allocation5 + $0x2d0] sm:$0xff] }
  0x52   :  { %1323 = vmatprep.subr.bf16.mxu0 %v1322_v35  ;;  %v1374_v12 = vpack.c.bf16 %v152_v9, %v151_v8  ;;  %v136_v14 = vld [vmem:[#allocation5 + $0x248] sm:$0xff]  ;;  %v154_v16 = vld [vmem:[#allocation5 + $0x2d8] sm:$0xff]  ;;  %v137_v19 = vld [vmem:[#allocation5 + $0x250] sm:$0xff] }
  0x53   :  { %1353 = vmatpush3.bf16.msra.mxu1 %v1352_v34  ;;  %v1376_v17 = vpack.c.bf16 %v136_v14, %v135_v13  ;;  %v1378_v18 = vpack.c.bf16 %v154_v16, %v153_v15  ;;  %v138_v20 = vld [vmem:[#allocation5 + $0x258] sm:$0xff]  ;;  %v155_v21 = vld [vmem:[#allocation5 + $0x2e0] sm:$0xff]  ;;  %v156_v22 = vld [vmem:[#allocation5 + $0x2e8] sm:$0xff] }
  0x54   :  { %1355 = vmatprep.subr.bf16.mxu1 %v1354_v40  ;;  %v1382_v24 = vpack.c.bf16 %v156_v22, %v155_v21  ;;  %v139_v25 = vld [vmem:[#allocation5 + $0x260] sm:$0xff]  ;;  %v140_v26 = vld [vmem:[#allocation5 + $0x268] sm:$0xff]  ;;  %v157_v27 = vld [vmem:[#allocation5 + $0x2f0] sm:$0xff] }
  0x55   :  { %1325 = vmatpush3.bf16.msra.mxu0 %v1324_v44  ;;  %v158_v28 = vld [vmem:[#allocation5 + $0x2f8] sm:$0xff]  ;;  %v1384_v29 = vpack.c.bf16 %v140_v26, %v139_v25  ;;  %v141_v31 = vld [vmem:[#allocation5 + $0x270] sm:$0xff]  ;;  %v159_v34 = vld [vmem:[#allocation5 + $0x300] sm:$0xff] }
  0x56   :  { %1359 = vmatprep.subr.bf16.mxu0 %v1358_v46  ;;  %v1386_v30 = vpack.c.bf16 %v158_v28, %v157_v27  ;;  %v160_v35 = vld [vmem:[#allocation5 + $0x308] sm:$0xff]  ;;  %v676_v39 = vld [vmem:[#allocation7] sm:$0xff]  ;;  %v677_v40 = vld [vmem:[#allocation7 + $0x8] sm:$0xff] }
  0x57   :  { %1357 = vmatpush3.bf16.msra.mxu1 %v1356_v45  ;;  %v1391_v37 = vpack.c.bf16 %v160_v35, %v159_v34  ;;  %v1394_v41 = vpack.c.bf16 %v677_v40, %v676_v39  ;;  %v678_v42 = vld [vmem:[#allocation7 + $0x10] sm:$0xff]  ;;  %v679_v43 = vld [vmem:[#allocation7 + $0x18] sm:$0xff]  ;;  %v680_v44 = vld [vmem:[#allocation7 + $0x20] sm:$0xff] }
  0x58   :  { %1393 = vmatprep.subr.bf16.mxu1 %v1504_v59  ;;  %277 = vmatmul.mubr.f32.vlgmr.msra.gmra.mrb[0].mxu0 %v177_v23  ;;  %v1380_v23 = vpack.c.bf16 %v138_v20, %v137_v19  ;;  %v1397_v45 = vpack.c.bf16 %v679_v43, %v678_v42  ;;  %v681_v46 = vld [vmem:[#allocation7 + $0x28] sm:$0xff]  ;;  %v682_v47 = vld [vmem:[#allocation7 + $0x30] sm:$0xff]  ;;  %v683_v48 = vld [vmem:[#allocation7 + $0x38] sm:$0xff] }
  0x59   :  { %1361 = vmatpush3.bf16.msra.mxu0 %v1360_v51  ;;  %416 = vmatprep.mubr.f32.mxu0 %v202_v60  ;;  %v1400_v10 = vpack.c.bf16 %v681_v46, %v680_v44  ;;  %v1403_v49 = vpack.c.bf16 %v683_v48, %v682_v47  ;;  %v684_v50 = vld [vmem:[#allocation7 + $0x40] sm:$0xff]  ;;  %v685_v51 = vld [vmem:[#allocation7 + $0x48] sm:$0xff]  ;;  %v687_v54 = vld [vmem:[#allocation7 + $0x58] sm:$0xff] }
  0x5a   :  { %347 = vmatmul.mubr.f32.vlgmr.msra.gmra.mrb[0].mxu1 %v184_v32  ;;  %1363 = vmatprep.subr.bf16.mxu0 %v1362_v53  ;;  %v142_v32 = vld [vmem:[#allocation5 + $0x278] sm:$0xff]  ;;  %v1406_v52 = vpack.c.bf16 %v685_v51, %v684_v50  ;;  %v686_v53 = vld [vmem:[#allocation7 + $0x50] sm:$0xff]  ;;  %v1050_v0 = vld [vmem:[%s1870_s2] ss:$0 sm:$0xff] }
  0x5b   :  { %1273 = vmatprep.mubr.msk.f32.mxu1 %vm1505_vm0, %v1506_v3  ;;  %v1388_v33 = vpack.c.bf16 %v142_v32, %v141_v31  ;;  %1395 = vmatpush3.bf16.msra.mxu1 %v1394_v41  ;;  %v1409_v55 = vpack.c.bf16 %v687_v54, %v686_v53  ;;  %v689_v57 = vld [vmem:[#allocation7 + $0x68] sm:$0xff]  ;;  %v690_v60 = vld [vmem:[#allocation7 + $0x70] sm:$0xff] }
  0x5c   :  { %1396 = vmatprep.subr.bf16.mxu1 %v1504_v59 }
  0x5d   :  { %1365 = vmatpush3.bf16.msra.mxu0 %v1364_v61  ;;  %v691_v61 = vld [vmem:[#allocation7 + $0x78] sm:$0xff] }
  0x5e   :  { %1367 = vmatprep.subr.bf16.mxu0 %v1366_v62  ;;  %v1415_v62 = vpack.c.bf16 %v691_v61, %v690_v60 }
  0x5f   :  { %1398 = vmatpush3.bf16.msra.mxu1 %v1397_v45 }
  0x60   :  { %1399 = vmatprep.subr.bf16.mxu1 %v1504_v59 }
  0x61   :  { %1369 = vmatpush3.bf16.msra.mxu0 %v1368_v4 }
  0x62   :  { %1371 = vmatprep.subr.bf16.mxu0 %v1370_v5 }
  0x63   :  { %1401 = vmatpush3.bf16.msra.mxu1 %v1400_v10 }
  0x64   :  { %1402 = vmatprep.subr.bf16.mxu1 %v1504_v59 }
  0x65   :  { %1373 = vmatpush3.bf16.msra.mxu0 %v1372_v11 }
  0x66   :  { %1375 = vmatprep.subr.bf16.mxu0 %v1374_v12 }
  0x67   :  { %1404 = vmatpush3.bf16.msra.mxu1 %v1403_v49 }
  0x68   :  { %1405 = vmatprep.subr.bf16.mxu1 %v1504_v59 }
  0x69   :  { %1377 = vmatpush3.bf16.msra.mxu0 %v1376_v17 }
  0x6a   :  { %1379 = vmatprep.subr.bf16.mxu0 %v1378_v18 }
  0x6b   :  { %1407 = vmatpush3.bf16.msra.mxu1 %v1406_v52 }
  0x6c   :  { %1408 = vmatprep.subr.bf16.mxu1 %v1504_v59 }
  0x6d   :  { %1381 = vmatpush3.bf16.msra.mxu0 %v1380_v23 }
  0x6e   :  { %1383 = vmatprep.subr.bf16.mxu0 %v1382_v24 }
  0x6f   :  { %1410 = vmatpush3.bf16.msra.mxu1 %v1409_v55 }
  0x70   :  { %1411 = vmatprep.subr.bf16.mxu1 %v1504_v59 }
  0x71   :  { %1385 = vmatpush3.bf16.msra.mxu0 %v1384_v29 }
  0x72   :  { %1387 = vmatprep.subr.bf16.mxu0 %v1386_v30 }
  0x75   :  { %1389 = vmatpush3.bf16.msra.mxu0 %v1388_v33 }
  0x76   :  { %1390 = vmatprep.subr.bf16.mxu0 %v1504_v59 }
  0x78   :  { %417 = vmatmul.mubr.f32.vlgmr.msra.gmra.mrb[2].mxu0 %v1592_v56  ;;  %v688_v56 = vld [vmem:[#allocation7 + $0x60] sm:$0xff] }
  0x79   :  { %1392 = vmatpush3.bf16.msra.mxu0 %v1391_v37  ;;  %1238 = vmatprep.mubr.msk.f32.mxu0 %vm1505_vm0, %v1506_v3  ;;  %v1412_v58 = vpack.c.bf16 %v689_v57, %v688_v56 }
  0x7b   :  { %1413 = vmatpush3.bf16.msra.mxu1 %v1412_v58 }
  0x7c   :  { %1239 = vmatmul.mubr.msk.f32.vlgmr.msra.gmra.mrb[4].mxu0 %vm209_vm1, %v201_v38  ;;  %1414 = vmatprep.subr.bf16.mxu1 %v1504_v59 }
  0x7f   :  { %1416 = vmatpush3.bf16.msra.mxu1 %v1415_v62 }
 0x12b   :  { %v1135_v63 = vpop.f32.mrb[0].mxu0 }
 0x12c   :  { %v1136_v1 = vpop.f32.mrb[1].mxu0 }
 0x12d   :  { %v1170_v2 = vpop.f32.mrb[0].mxu1  ;;  %v1137_v4 = vadd.f32 %v1136_v1, %v1135_v63 }
 0x12e   :  { %v1171_v5 = vpop.f32.mrb[1].mxu1 }
 0x12f   :  { %v1172_v6 = vadd.f32 %v1171_v5, %v1170_v2  ;;  %v279_v7 = vadd.f32 %v1137_v4, %v1050_v0 }
 0x131   :  { %v349_v8 = vadd.f32 %v1172_v6, %v279_v7 }
 0x14b   :  { %v1205_v9 = vpop.f32.mrb[2].mxu0 }
 0x14c   :  { %v1206_v11 = vpop.f32.mrb[3].mxu0 }
 0x14d   :  { %v1207_v12 = vadd.f32 %v1206_v11, %v1205_v9 }
 0x14f   :  { %v419_v13 = vadd.f32 %v1207_v12, %v349_v8  ;;  %v488_v14 = vpop.f32.mrb[4].mxu0 }
 0x150   :  { %v1240_v15 = vpop.f32.mrb[5].mxu0 }
 0x151   :  { %v1616_v59 = vadd.f32 %v488_v14, %v419_v13 }
 0x153   :  { %vm497_vm2 = vcmp.gt.f32.partialorder %v1616_v59, 1.0  ;;  %v501_v16 = vmul.f32 0.95, %v1616_v59 }
 0x154   :  { %v1052_v17 = vsel %vm497_vm2, 1.0, %v1506_v3 }
 0x155   :  { %500 = vst [vmem:[#allocation2] sm:$0x3] %v1052_v17  ;;  %v502_v18 = vadd.f32 %v501_v16, %v1616_v59 }
 0x157   :  { %v503_v19 = vsub.f32 %v502_v18, %v1052_v17 }
 0x159   :  { %vm504_vm3 = vcmp.gt.f32.partialorder %v503_v19, 1.0  ;;  %v508_v20 = vmul.f32 0.95, %v503_v19 }
 0x15a   :  { %v1053_v21 = vsel %vm504_vm3, 1.0, %v1506_v3 }
 0x15b   :  { %507 = vst [vmem:[#allocation2 + $0x2] sm:$0x3] %v1053_v21  ;;  %v509_v22 = vadd.f32 %v508_v20, %v1616_v59 }
 0x15d   :  { %v510_v23 = vsub.f32 %v509_v22, %v1053_v21 }
 0x15f   :  { %vm511_vm4 = vcmp.gt.f32.partialorder %v510_v23, 1.0  ;;  %v515_v24 = vmul.f32 0.95, %v510_v23 }
 0x160   :  { %v1054_v25 = vsel %vm511_vm4, 1.0, %v1506_v3 }
 0x161   :  { %514 = vst [vmem:[#allocation2 + $0x4] sm:$0x3] %v1054_v25  ;;  %v516_v26 = vadd.f32 %v515_v24, %v1616_v59 }
 0x163   :  { %v517_v27 = vsub.f32 %v516_v26, %v1054_v25 }
 0x165   :  { %vm518_vm5 = vcmp.gt.f32.partialorder %v517_v27, 1.0  ;;  %v522_v28 = vmul.f32 0.95, %v517_v27 }
 0x166   :  { %v1055_v29 = vsel %vm518_vm5, 1.0, %v1506_v3 }
 0x167   :  { %521 = vst [vmem:[#allocation2 + $0x6] sm:$0x3] %v1055_v29  ;;  %v523_v30 = vadd.f32 %v522_v28, %v1616_v59 }
 0x169   :  { %v524_v31 = vsub.f32 %v523_v30, %v1055_v29 }
 0x16b   :  { %v529_v32 = vmul.f32 0.95, %v524_v31  ;;  %vm525_vm6 = vcmp.gt.f32.partialorder %v524_v31, 1.0 }
 0x16c   :  { %v1056_v33 = vsel %vm525_vm6, 1.0, %v1506_v3 }
 0x16d   :  { %528 = vst [vmem:[#allocation2 + $0x8] sm:$0x3] %v1056_v33  ;;  %v530_v34 = vadd.f32 %v529_v32, %v1616_v59 }
 0x16e   :  { %v669_v35 = vld [vmem:[#allocation2] sm:$0xff] }
 0x16f   :  { %1274 = vmatmul.mubr.f32.vlgmr.msra.gmra.mrb[2].mxu1 %v669_v35  ;;  %v531_v36 = vsub.f32 %v530_v34, %v1056_v33 }
 0x170   :  { %1276 = vmatprep.mubr.msk.f32.mxu1 %vm1505_vm0, %v1506_v3 }
 0x171   :  { %vm532_vm7 = vcmp.gt.f32.partialorder %v531_v36, 1.0  ;;  %v536_v37 = vmul.f32 0.95, %v531_v36 }
 0x172   :  { %v1057_v38 = vsel %vm532_vm7, 1.0, %v1506_v3 }
 0x173   :  { %535 = vst [vmem:[#allocation2 + $0xa] sm:$0x3] %v1057_v38  ;;  %v537_v39 = vadd.f32 %v536_v37, %v1616_v59 }
 0x175   :  { %v538_v40 = vsub.f32 %v537_v39, %v1057_v38 }
 0x177   :  { %vm539_vm8 = vcmp.gt.f32.partialorder %v538_v40, 1.0  ;;  %v543_v41 = vmul.f32 0.95, %v538_v40 }
 0x178   :  { %v1058_v42 = vsel %vm539_vm8, 1.0, %v1506_v3 }
 0x179   :  { %542 = vst [vmem:[#allocation2 + $0xc] sm:$0x3] %v1058_v42  ;;  %v544_v43 = vadd.f32 %v543_v41, %v1616_v59 }
 0x17b   :  { %v545_v44 = vsub.f32 %v544_v43, %v1058_v42 }
 0x17d   :  { %vm546_vm9 = vcmp.gt.f32.partialorder %v545_v44, 1.0  ;;  %v550_v45 = vmul.f32 0.95, %v545_v44 }
 0x17e   :  { %v1059_v46 = vsel %vm546_vm9, 1.0, %v1506_v3 }
 0x17f   :  { %549 = vst [vmem:[#allocation2 + $0xe] sm:$0x3] %v1059_v46  ;;  %v551_v10 = vadd.f32 %v550_v45, %v1616_v59 }
 0x181   :  { %v552_v47 = vsub.f32 %v551_v10, %v1059_v46 }
 0x183   :  { %v557_v48 = vmul.f32 0.95, %v552_v47  ;;  %vm553_vm10 = vcmp.gt.f32.partialorder %v552_v47, 1.0 }
 0x184   :  { %v1060_v49 = vsel %vm553_vm10, 1.0, %v1506_v3 }
 0x185   :  { %556 = vst [vmem:[#allocation2 + $0x10] sm:$0x3] %v1060_v49  ;;  %v558_v50 = vadd.f32 %v557_v48, %v1616_v59 }
 0x186   :  { %v670_v51 = vld [vmem:[#allocation2 + $0x8] sm:$0xff] }
 0x187   :  { %1277 = vmatmul.mubr.f32.gmra.mrb[4].mxu1 %v670_v51  ;;  %v559_v52 = vsub.f32 %v558_v50, %v1060_v49 }
 0x188   :  { %1279 = vmatprep.mubr.msk.f32.mxu1 %vm1505_vm0, %v1506_v3 }
 0x189   :  { %vm560_vm11 = vcmp.gt.f32.partialorder %v559_v52, 1.0  ;;  %v564_v53 = vmul.f32 0.95, %v559_v52 }
 0x18a   :  { %v1061_v54 = vsel %vm560_vm11, 1.0, %v1506_v3 }
 0x18b   :  { %563 = vst [vmem:[#allocation2 + $0x12] sm:$0x3] %v1061_v54  ;;  %v565_v55 = vadd.f32 %v564_v53, %v1616_v59 }
 0x18d   :  { %v566_v56 = vsub.f32 %v565_v55, %v1061_v54 }
 0x18f   :  { %vm567_vm12 = vcmp.gt.f32.partialorder %v566_v56, 1.0  ;;  %v571_v57 = vmul.f32 0.95, %v566_v56 }
 0x190   :  { %v1062_v58 = vsel %vm567_vm12, 1.0, %v1506_v3 }
 0x191   :  { %570 = vst [vmem:[#allocation2 + $0x14] sm:$0x3] %v1062_v58  ;;  %v572_v60 = vadd.f32 %v571_v57, %v1616_v59  ;;  %v1684_v57 = vld [vmem:[%s1872_s4] ss:$0 sm:$0xff] }
 0x193   :  { %v573_v61 = vsub.f32 %v572_v60, %v1062_v58 }
 0x195   :  { %vm574_vm13 = vcmp.gt.f32.partialorder %v573_v61, 1.0  ;;  %v578_v62 = vmul.f32 0.95, %v573_v61 }
 0x196   :  { %v1063_v63 = vsel %vm574_vm13, 1.0, %v1506_v3 }
 0x197   :  { %577 = vst [vmem:[#allocation2 + $0x16] sm:$0x3] %v1063_v63  ;;  %v579_v0 = vadd.f32 %v578_v62, %v1616_v59 }
 0x199   :  { %v580_v1 = vsub.f32 %v579_v0, %v1063_v63 }
 0x19b   :  { %v585_v2 = vmul.f32 0.95, %v580_v1  ;;  %vm581_vm14 = vcmp.gt.f32.partialorder %v580_v1, 1.0 }
 0x19c   :  { %v1064_v4 = vsel %vm581_vm14, 1.0, %v1506_v3 }
 0x19d   :  { %584 = vst [vmem:[#allocation2 + $0x18] sm:$0x3] %v1064_v4  ;;  %v586_v5 = vadd.f32 %v585_v2, %v1616_v59 }
 0x19e   :  { %v671_v6 = vld [vmem:[#allocation2 + $0x10] sm:$0xff] }
 0x19f   :  { %1280 = vmatmul.mubr.f32.gmra.mrb[6].mxu1 %v671_v6  ;;  %v587_v7 = vsub.f32 %v586_v5, %v1064_v4 }
 0x1a0   :  { %1282 = vmatprep.mubr.msk.f32.mxu1 %vm1505_vm0, %v1506_v3 }
 0x1a1   :  { %vm588_vm15 = vcmp.gt.f32.partialorder %v587_v7, 1.0  ;;  %v592_v8 = vmul.f32 0.95, %v587_v7 }
 0x1a2   :  { %v1065_v9 = vsel %vm588_vm15, 1.0, %v1506_v3 }
 0x1a3   :  { %591 = vst [vmem:[#allocation2 + $0x1a] sm:$0x3] %v1065_v9  ;;  %v593_v11 = vadd.f32 %v592_v8, %v1616_v59 }
 0x1a5   :  { %v594_v12 = vsub.f32 %v593_v11, %v1065_v9 }
 0x1a7   :  { %vm595_vm1 = vcmp.gt.f32.partialorder %v594_v12, 1.0  ;;  %v599_v13 = vmul.f32 0.95, %v594_v12 }
 0x1a8   :  { %v1066_v14 = vsel %vm595_vm1, 1.0, %v1506_v3 }
 0x1a9   :  { %598 = vst [vmem:[#allocation2 + $0x1c] sm:$0x3] %v1066_v14  ;;  %v600_v15 = vadd.f32 %v599_v13, %v1616_v59 }
 0x1ab   :  { %v601_v16 = vsub.f32 %v600_v15, %v1066_v14 }
 0x1ad   :  { %vm602_vm2 = vcmp.gt.f32.partialorder %v601_v16, 1.0  ;;  %v606_v17 = vmul.f32 0.95, %v601_v16 }
 0x1ae   :  { %v1067_v18 = vsel %vm602_vm2, 1.0, %v1506_v3 }
 0x1af   :  { %605 = vst [vmem:[#allocation2 + $0x1e] sm:$0x3] %v1067_v18  ;;  %v607_v19 = vadd.f32 %v606_v17, %v1616_v59 }
 0x1b1   :  { %v608_v20 = vsub.f32 %v607_v19, %v1067_v18 }
 0x1b3   :  { %v613_v21 = vmul.f32 0.95, %v608_v20  ;;  %vm609_vm3 = vcmp.gt.f32.partialorder %v608_v20, 1.0 }
 0x1b4   :  { %v1068_v22 = vsel %vm609_vm3, 1.0, %v1506_v3 }
 0x1b5   :  { %612 = vst [vmem:[#allocation2 + $0x20] sm:$0x3] %v1068_v22  ;;  %v614_v23 = vadd.f32 %v613_v21, %v1616_v59 }
 0x1b6   :  { %v672_v24 = vld [vmem:[#allocation2 + $0x18] sm:$0xff] }
 0x1b7   :  { %1283 = vmatmul.mubr.f32.gmra.mrb[8].mxu1 %v672_v24  ;;  %v615_v25 = vsub.f32 %v614_v23, %v1068_v22 }
 0x1b8   :  { %1285 = vmatprep.mubr.msk.f32.mxu1 %vm1505_vm0, %v1506_v3 }
 0x1b9   :  { %vm616_vm4 = vcmp.gt.f32.partialorder %v615_v25, 1.0  ;;  %v620_v26 = vmul.f32 0.95, %v615_v25 }
 0x1ba   :  { %v1069_v27 = vsel %vm616_vm4, 1.0, %v1506_v3 }
 0x1bb   :  { %619 = vst [vmem:[#allocation2 + $0x22] sm:$0x3] %v1069_v27  ;;  %v621_v28 = vadd.f32 %v620_v26, %v1616_v59 }
 0x1bd   :  { %v622_v29 = vsub.f32 %v621_v28, %v1069_v27 }
 0x1bf   :  { %vm623_vm5 = vcmp.gt.f32.partialorder %v622_v29, 1.0  ;;  %v627_v30 = vmul.f32 0.95, %v622_v29 }
 0x1c0   :  { %v1070_v31 = vsel %vm623_vm5, 1.0, %v1506_v3 }
 0x1c1   :  { %626 = vst [vmem:[#allocation2 + $0x24] sm:$0x3] %v1070_v31  ;;  %v628_v32 = vadd.f32 %v627_v30, %v1616_v59 }
 0x1c3   :  { %v629_v33 = vsub.f32 %v628_v32, %v1070_v31 }
 0x1c5   :  { %vm630_vm6 = vcmp.gt.f32.partialorder %v629_v33, 1.0  ;;  %v634_v34 = vmul.f32 0.95, %v629_v33 }
 0x1c6   :  { %v1071_v35 = vsel %vm630_vm6, 1.0, %v1506_v3 }
 0x1c7   :  { %633 = vst [vmem:[#allocation2 + $0x26] sm:$0x3] %v1071_v35  ;;  %v635_v36 = vadd.f32 %v634_v34, %v1616_v59 }
 0x1c9   :  { %v636_v37 = vsub.f32 %v635_v36, %v1071_v35 }
 0x1cb   :  { %v641_v38 = vmul.f32 0.95, %v636_v37  ;;  %vm637_vm7 = vcmp.gt.f32.partialorder %v636_v37, 1.0 }
 0x1cc   :  { %v1072_v39 = vsel %vm637_vm7, 1.0, %v1506_v3 }
 0x1cd   :  { %640 = vst [vmem:[#allocation2 + $0x28] sm:$0x3] %v1072_v39  ;;  %v642_v40 = vadd.f32 %v641_v38, %v1616_v59 }
 0x1ce   :  { %v673_v41 = vld [vmem:[#allocation2 + $0x20] sm:$0xff] }
 0x1cf   :  { %1286 = vmatmul.mubr.f32.gmra.mrb[10].mxu1 %v673_v41  ;;  %v643_v42 = vsub.f32 %v642_v40, %v1072_v39 }
 0x1d0   :  { %1288 = vmatprep.mubr.msk.f32.mxu1 %vm1505_vm0, %v1506_v3 }
 0x1d1   :  { %vm644_vm8 = vcmp.gt.f32.partialorder %v643_v42, 1.0  ;;  %v648_v43 = vmul.f32 0.95, %v643_v42 }
 0x1d2   :  { %v1073_v44 = vsel %vm644_vm8, 1.0, %v1506_v3 }
 0x1d3   :  { %647 = vst [vmem:[#allocation2 + $0x2a] sm:$0x3] %v1073_v44  ;;  %v649_v45 = vadd.f32 %v648_v43, %v1616_v59 }
 0x1d5   :  { %v650_v46 = vsub.f32 %v649_v45, %v1073_v44 }
 0x1d7   :  { %vm651_vm9 = vcmp.gt.f32.partialorder %v650_v46, 1.0  ;;  %v655_v10 = vmul.f32 0.95, %v650_v46 }
 0x1d8   :  { %v1074_v47 = vsel %vm651_vm9, 1.0, %v1506_v3 }
 0x1d9   :  { %654 = vst [vmem:[#allocation2 + $0x2c] sm:$0x3] %v1074_v47  ;;  %v656_v48 = vadd.f32 %v655_v10, %v1616_v59 }
 0x1db   :  { %v657_v49 = vsub.f32 %v656_v48, %v1074_v47 }
 0x1dd   :  { %vm658_vm10 = vcmp.gt.f32.partialorder %v657_v49, 1.0  ;;  %v662_v50 = vmul.f32 0.95, %v657_v49 }
 0x1de   :  { %v1075_v51 = vsel %vm658_vm10, 1.0, %v1506_v3 }
 0x1df   :  { %661 = vst [vmem:[#allocation2 + $0x2e] sm:$0x3] %v1075_v51  ;;  %v663_v52 = vadd.f32 %v662_v50, %v1616_v59 }
 0x1e1   :  { %v664_v53 = vsub.f32 %v663_v52, %v1075_v51 }
 0x1e3   :  { %vm665_vm11 = vcmp.gt.f32.partialorder %v664_v53, 1.0 }
 0x1e4   :  { %v1076_v54 = vsel %vm665_vm11, 1.0, %v1506_v3 }
 0x1e5   :  { %668 = vst [vmem:[#allocation2 + $0x30] sm:$0x3] %v1076_v54 }
 0x1e6   :  { %v674_v55 = vld [vmem:[#allocation2 + $0x28] sm:$0xff] }
 0x1e7   :  { %1289 = vmatmul.mubr.f32.gmra.mrb[12].mxu1 %v674_v55 }
 0x1e8   :  { %1291 = vmatprep.mubr.msk.f32.mxu1 %vm1505_vm0, %v1506_v3 }
 0x1ec   :  { %v675_v56 = vld [vmem:[#allocation2 + $0x30] sm:$0x3] }
 0x1ed   :  { %1292 = vmatmul.mubr.f32.gmra.mrb[14].mxu1 %v675_v56 }
 0x242   :  { %v765_v58 = vpop.f32.mrb[2].mxu1 }
 0x243   :  { %v766_v59 = vadd.f32 %v1684_v57, %v765_v58  ;;  %v1275_v60 = vpop.f32.mrb[3].mxu1 }
 0x245   :  { %vm801_vm12 = vcmp.gt.f32.partialorder %v766_v59, 1.0  ;;  %805 = vst [vmem:[%s1874_s6] sm:$0x3] %v766_v59  ;;  %v806_v61 = vmul.f32 0.95, %v766_v59  ;;  %v808_v62 = vrot.slane %v766_v59, 2  ;;  %v818_v4 = vrot.slane %v766_v59, 4 }
 0x246   :  { %v1078_v63 = vsel %vm801_vm12, 1.0, %v1506_v3  ;;  %v828_v8 = vrot.slane %v766_v59, 6 }
 0x247   :  { %804 = vst [vmem:[%s1873_s5] sm:$0x3] %v1078_v63  ;;  %v810_v0 = vadd.f32 %v808_v62, %v806_v61 }
 0x249   :  { %v811_v1 = vsub.f32 %v810_v0, %v1078_v63 }
 0x24b   :  { %816 = vst [vmem:[%s1874_s6 + $0x2] sm:$0x3] %v811_v1  ;;  %v817_v2 = vmul.f32 0.95, %v811_v1  ;;  %vm812_vm0 = vcmp.gt.f32.partialorder %v811_v1, 1.0 }
 0x24c   :  { %v1079_v5 = vsel %vm812_vm0, 1.0, %v1506_v3 }
 0x24d   :  { %v820_v6 = vadd.f32 %v818_v4, %v817_v2  ;;  %815 = vst [vmem:[%s1873_s5 + $0x2] sm:$0x3] %v1079_v5 }
 0x24f   :  { %v821_v7 = vsub.f32 %v820_v6, %v1079_v5 }
 0x251   :  { %vm822_vm13 = vcmp.gt.f32.partialorder %v821_v7, 1.0  ;;  %826 = vst [vmem:[%s1874_s6 + $0x4] sm:$0x3] %v821_v7  ;;  %v827_v9 = vmul.f32 0.95, %v821_v7 }
 0x252   :  { %v1080_v11 = vsel %vm822_vm13, 1.0, %v1506_v3 }
 0x253   :  { %825 = vst [vmem:[%s1873_s5 + $0x4] sm:$0x3] %v1080_v11  ;;  %v830_v12 = vadd.f32 %v828_v8, %v827_v9 }
 0x255   :  { %v831_v13 = vsub.f32 %v830_v12, %v1080_v11 }
 0x257   :  { %vm832_vm14 = vcmp.gt.f32.partialorder %v831_v13, 1.0  ;;  %836 = vst [vmem:[%s1874_s6 + $0x6] sm:$0x3] %v831_v13  ;;  %v837_v17 = vmul.f32 0.95, %v831_v13 }
 0x258   :  { %v1081_v14 = vsel %vm832_vm14, 1.0, %v1506_v3 }
 0x259   :  { %835 = vst [vmem:[%s1873_s5 + $0x6] sm:$0x3] %v1081_v14 }
 0x25a   :  { %v770_v15 = vpop.f32.mrb[4].mxu1 }
 0x25b   :  { %v771_v16 = vadd.f32 %v1684_v57, %v770_v15  ;;  %v1278_v18 = vpop.f32.mrb[5].mxu1 }
 0x25d   :  { %v838_v19 = vadd.f32 %v837_v17, %v771_v16  ;;  %v847_v22 = vrot.slane %v771_v16, 2  ;;  %v857_v27 = vrot.slane %v771_v16, 4  ;;  %v867_v32 = vrot.slane %v771_v16, 6 }
 0x25f   :  { %v839_v20 = vsub.f32 %v838_v19, %v1081_v14 }
 0x261   :  { %vm840_vm15 = vcmp.gt.f32.partialorder %v839_v20, 1.0  ;;  %844 = vst [vmem:[%s1874_s6 + $0x8] sm:$0x3] %v839_v20  ;;  %v845_v21 = vmul.f32 0.95, %v839_v20 }
 0x262   :  { %v1082_v23 = vsel %vm840_vm15, 1.0, %v1506_v3 }
 0x263   :  { %843 = vst [vmem:[%s1873_s5 + $0x8] sm:$0x3] %v1082_v23  ;;  %v849_v24 = vadd.f32 %v847_v22, %v845_v21 }
 0x265   :  { %v850_v25 = vsub.f32 %v849_v24, %v1082_v23 }
 0x267   :  { %vm851_vm1 = vcmp.gt.f32.partialorder %v850_v25, 1.0  ;;  %855 = vst [vmem:[%s1874_s6 + $0xa] sm:$0x3] %v850_v25  ;;  %v856_v26 = vmul.f32 0.95, %v850_v25 }
 0x268   :  { %v1083_v28 = vsel %vm851_vm1, 1.0, %v1506_v3 }
 0x269   :  { %854 = vst [vmem:[%s1873_s5 + $0xa] sm:$0x3] %v1083_v28  ;;  %v859_v29 = vadd.f32 %v857_v27, %v856_v26 }
 0x26b   :  { %v860_v30 = vsub.f32 %v859_v29, %v1083_v28 }
 0x26d   :  { %vm861_vm2 = vcmp.gt.f32.partialorder %v860_v30, 1.0  ;;  %865 = vst [vmem:[%s1874_s6 + $0xc] sm:$0x3] %v860_v30  ;;  %v866_v31 = vmul.f32 0.95, %v860_v30 }
 0x26e   :  { %v1084_v33 = vsel %vm861_vm2, 1.0, %v1506_v3 }
 0x26f   :  { %864 = vst [vmem:[%s1873_s5 + $0xc] sm:$0x3] %v1084_v33  ;;  %v869_v34 = vadd.f32 %v867_v32, %v866_v31 }
 0x271   :  { %v870_v35 = vsub.f32 %v869_v34, %v1084_v33 }
 0x272   :  { %v775_v36 = vpop.f32.mrb[6].mxu1 }
 0x273   :  { %875 = vst [vmem:[%s1874_s6 + $0xe] sm:$0x3] %v870_v35  ;;  %v776_v37 = vadd.f32 %v1684_v57, %v775_v36  ;;  %vm871_vm3 = vcmp.gt.f32.partialorder %v870_v35, 1.0  ;;  %v876_v38 = vmul.f32 0.95, %v870_v35  ;;  %v1281_v39 = vpop.f32.mrb[7].mxu1 }
 0x274   :  { %v1085_v40 = vsel %vm871_vm3, 1.0, %v1506_v3 }
 0x275   :  { %874 = vst [vmem:[%s1873_s5 + $0xe] sm:$0x3] %v1085_v40  ;;  %v877_v41 = vadd.f32 %v876_v38, %v776_v37  ;;  %v886_v44 = vrot.slane %v776_v37, 2  ;;  %v896_v48 = vrot.slane %v776_v37, 4  ;;  %v906_v53 = vrot.slane %v776_v37, 6 }
 0x277   :  { %v878_v42 = vsub.f32 %v877_v41, %v1085_v40 }
 0x279   :  { %vm879_vm4 = vcmp.gt.f32.partialorder %v878_v42, 1.0  ;;  %883 = vst [vmem:[%s1874_s6 + $0x10] sm:$0x3] %v878_v42  ;;  %v884_v43 = vmul.f32 0.95, %v878_v42 }
 0x27a   :  { %v1086_v45 = vsel %vm879_vm4, 1.0, %v1506_v3 }
 0x27b   :  { %882 = vst [vmem:[%s1873_s5 + $0x10] sm:$0x3] %v1086_v45  ;;  %v888_v46 = vadd.f32 %v886_v44, %v884_v43 }
 0x27d   :  { %v889_v10 = vsub.f32 %v888_v46, %v1086_v45 }
 0x27f   :  { %vm890_vm5 = vcmp.gt.f32.partialorder %v889_v10, 1.0  ;;  %894 = vst [vmem:[%s1874_s6 + $0x12] sm:$0x3] %v889_v10  ;;  %v895_v47 = vmul.f32 0.95, %v889_v10 }
 0x280   :  { %v1087_v49 = vsel %vm890_vm5, 1.0, %v1506_v3 }
 0x281   :  { %893 = vst [vmem:[%s1873_s5 + $0x12] sm:$0x3] %v1087_v49  ;;  %v898_v50 = vadd.f32 %v896_v48, %v895_v47 }
 0x283   :  { %v899_v51 = vsub.f32 %v898_v50, %v1087_v49 }
 0x285   :  { %vm900_vm6 = vcmp.gt.f32.partialorder %v899_v51, 1.0  ;;  %904 = vst [vmem:[%s1874_s6 + $0x14] sm:$0x3] %v899_v51  ;;  %v905_v52 = vmul.f32 0.95, %v899_v51 }
 0x286   :  { %v1088_v54 = vsel %vm900_vm6, 1.0, %v1506_v3 }
 0x287   :  { %903 = vst [vmem:[%s1873_s5 + $0x14] sm:$0x3] %v1088_v54  ;;  %v908_v55 = vadd.f32 %v906_v53, %v905_v52 }
 0x289   :  { %v909_v56 = vsub.f32 %v908_v55, %v1088_v54 }
 0x28a   :  { %v780_v58 = vpop.f32.mrb[8].mxu1 }
 0x28b   :  { %914 = vst [vmem:[%s1874_s6 + $0x16] sm:$0x3] %v909_v56  ;;  %v781_v59 = vadd.f32 %v1684_v57, %v780_v58  ;;  %vm910_vm7 = vcmp.gt.f32.partialorder %v909_v56, 1.0  ;;  %v915_v60 = vmul.f32 0.95, %v909_v56  ;;  %v1284_v61 = vpop.f32.mrb[9].mxu1 }
 0x28c   :  { %v1089_v62 = vsel %vm910_vm7, 1.0, %v1506_v3 }
 0x28d   :  { %913 = vst [vmem:[%s1873_s5 + $0x16] sm:$0x3] %v1089_v62  ;;  %v916_v63 = vadd.f32 %v915_v60, %v781_v59  ;;  %v925_v2 = vrot.slane %v781_v59, 2  ;;  %v935_v8 = vrot.slane %v781_v59, 4  ;;  %v945_v14 = vrot.slane %v781_v59, 6 }
 0x28f   :  { %v917_v0 = vsub.f32 %v916_v63, %v1089_v62 }
 0x291   :  { %vm918_vm8 = vcmp.gt.f32.partialorder %v917_v0, 1.0  ;;  %922 = vst [vmem:[%s1874_s6 + $0x18] sm:$0x3] %v917_v0  ;;  %v923_v1 = vmul.f32 0.95, %v917_v0 }
 0x292   :  { %v1090_v4 = vsel %vm918_vm8, 1.0, %v1506_v3 }
 0x293   :  { %921 = vst [vmem:[%s1873_s5 + $0x18] sm:$0x3] %v1090_v4  ;;  %v927_v5 = vadd.f32 %v925_v2, %v923_v1 }
 0x295   :  { %v928_v6 = vsub.f32 %v927_v5, %v1090_v4 }
 0x297   :  { %vm929_vm9 = vcmp.gt.f32.partialorder %v928_v6, 1.0  ;;  %933 = vst [vmem:[%s1874_s6 + $0x1a] sm:$0x3] %v928_v6  ;;  %v934_v7 = vmul.f32 0.95, %v928_v6 }
 0x298   :  { %v1091_v9 = vsel %vm929_vm9, 1.0, %v1506_v3 }
 0x299   :  { %932 = vst [vmem:[%s1873_s5 + $0x1a] sm:$0x3] %v1091_v9  ;;  %v937_v11 = vadd.f32 %v935_v8, %v934_v7 }
 0x29b   :  { %v938_v12 = vsub.f32 %v937_v11, %v1091_v9 }
 0x29d   :  { %vm939_vm10 = vcmp.gt.f32.partialorder %v938_v12, 1.0  ;;  %943 = vst [vmem:[%s1874_s6 + $0x1c] sm:$0x3] %v938_v12  ;;  %v944_v13 = vmul.f32 0.95, %v938_v12 }
 0x29e   :  { %v1092_v15 = vsel %vm939_vm10, 1.0, %v1506_v3 }
 0x29f   :  { %942 = vst [vmem:[%s1873_s5 + $0x1c] sm:$0x3] %v1092_v15  ;;  %v947_v16 = vadd.f32 %v945_v14, %v944_v13 }
 0x2a1   :  { %v948_v17 = vsub.f32 %v947_v16, %v1092_v15 }
 0x2a2   :  { %v785_v18 = vpop.f32.mrb[10].mxu1 }
 0x2a3   :  { %953 = vst [vmem:[%s1874_s6 + $0x1e] sm:$0x3] %v948_v17  ;;  %v786_v19 = vadd.f32 %v1684_v57, %v785_v18  ;;  %vm949_vm11 = vcmp.gt.f32.partialorder %v948_v17, 1.0  ;;  %v954_v20 = vmul.f32 0.95, %v948_v17  ;;  %v1287_v21 = vpop.f32.mrb[11].mxu1 }
 0x2a4   :  { %v1093_v22 = vsel %vm949_vm11, 1.0, %v1506_v3 }
 0x2a5   :  { %952 = vst [vmem:[%s1873_s5 + $0x1e] sm:$0x3] %v1093_v22  ;;  %v955_v23 = vadd.f32 %v954_v20, %v786_v19  ;;  %v964_v26 = vrot.slane %v786_v19, 2  ;;  %v974_v31 = vrot.slane %v786_v19, 4  ;;  %v984_v36 = vrot.slane %v786_v19, 6 }
 0x2a7   :  { %v956_v24 = vsub.f32 %v955_v23, %v1093_v22 }
 0x2a9   :  { %vm957_vm12 = vcmp.gt.f32.partialorder %v956_v24, 1.0  ;;  %961 = vst [vmem:[%s1874_s6 + $0x20] sm:$0x3] %v956_v24  ;;  %v962_v25 = vmul.f32 0.95, %v956_v24 }
 0x2aa   :  { %v1094_v27 = vsel %vm957_vm12, 1.0, %v1506_v3 }
 0x2ab   :  { %960 = vst [vmem:[%s1873_s5 + $0x20] sm:$0x3] %v1094_v27  ;;  %v966_v28 = vadd.f32 %v964_v26, %v962_v25 }
 0x2ad   :  { %v967_v29 = vsub.f32 %v966_v28, %v1094_v27 }
 0x2af   :  { %vm968_vm0 = vcmp.gt.f32.partialorder %v967_v29, 1.0  ;;  %972 = vst [vmem:[%s1874_s6 + $0x22] sm:$0x3] %v967_v29  ;;  %v973_v30 = vmul.f32 0.95, %v967_v29 }
 0x2b0   :  { %v1095_v32 = vsel %vm968_vm0, 1.0, %v1506_v3 }
 0x2b1   :  { %971 = vst [vmem:[%s1873_s5 + $0x22] sm:$0x3] %v1095_v32  ;;  %v976_v33 = vadd.f32 %v974_v31, %v973_v30 }
 0x2b3   :  { %v977_v34 = vsub.f32 %v976_v33, %v1095_v32 }
 0x2b5   :  { %vm978_vm13 = vcmp.gt.f32.partialorder %v977_v34, 1.0  ;;  %982 = vst [vmem:[%s1874_s6 + $0x24] sm:$0x3] %v977_v34  ;;  %v983_v35 = vmul.f32 0.95, %v977_v34 }
 0x2b6   :  { %v1096_v37 = vsel %vm978_vm13, 1.0, %v1506_v3 }
 0x2b7   :  { %981 = vst [vmem:[%s1873_s5 + $0x24] sm:$0x3] %v1096_v37  ;;  %v986_v38 = vadd.f32 %v984_v36, %v983_v35 }
 0x2b9   :  { %v987_v39 = vsub.f32 %v986_v38, %v1096_v37 }
 0x2ba   :  { %v790_v40 = vpop.f32.mrb[12].mxu1 }
 0x2bb   :  { %992 = vst [vmem:[%s1874_s6 + $0x26] sm:$0x3] %v987_v39  ;;  %v791_v41 = vadd.f32 %v1684_v57, %v790_v40  ;;  %vm988_vm14 = vcmp.gt.f32.partialorder %v987_v39, 1.0  ;;  %v993_v42 = vmul.f32 0.95, %v987_v39  ;;  %v1290_v43 = vpop.f32.mrb[13].mxu1 }
 0x2bc   :  { %v1097_v44 = vsel %vm988_vm14, 1.0, %v1506_v3 }
 0x2bd   :  { %991 = vst [vmem:[%s1873_s5 + $0x26] sm:$0x3] %v1097_v44  ;;  %v994_v45 = vadd.f32 %v993_v42, %v791_v41  ;;  %v1003_v48 = vrot.slane %v791_v41, 2  ;;  %v1013_v54 = vrot.slane %v791_v41, 4  ;;  %v1023_v60 = vrot.slane %v791_v41, 6 }
 0x2bf   :  { %v995_v46 = vsub.f32 %v994_v45, %v1097_v44 }
 0x2c0   :  { %v795_v10 = vpop.f32.mrb[14].mxu1 }
 0x2c1   :  { %vm996_vm15 = vcmp.gt.f32.partialorder %v995_v46, 1.0  ;;  %1000 = vst [vmem:[%s1874_s6 + $0x28] sm:$0x3] %v995_v46  ;;  %v1001_v47 = vmul.f32 0.95, %v995_v46  ;;  %v1293_v49 = vpop.f32.mrb[15].mxu1  ;;  %v796_v0 = vadd.f32 %v1684_v57, %v795_v10 }
 0x2c2   :  { %v1098_v50 = vsel %vm996_vm15, 1.0, %v1506_v3 }
 0x2c3   :  { %999 = vst [vmem:[%s1873_s5 + $0x28] sm:$0x3] %v1098_v50  ;;  %v1005_v51 = vadd.f32 %v1003_v48, %v1001_v47 }
 0x2c5   :  { %v1006_v52 = vsub.f32 %v1005_v51, %v1098_v50 }
 0x2c7   :  { %vm1007_vm1 = vcmp.gt.f32.partialorder %v1006_v52, 1.0  ;;  %1011 = vst [vmem:[%s1874_s6 + $0x2a] sm:$0x3] %v1006_v52  ;;  %v1012_v53 = vmul.f32 0.95, %v1006_v52 }
 0x2c8   :  { %v1099_v55 = vsel %vm1007_vm1, 1.0, %v1506_v3 }
 0x2c9   :  { %1010 = vst [vmem:[%s1873_s5 + $0x2a] sm:$0x3] %v1099_v55  ;;  %v1015_v56 = vadd.f32 %v1013_v54, %v1012_v53 }
 0x2cb   :  { %v1016_v58 = vsub.f32 %v1015_v56, %v1099_v55 }
 0x2cd   :  { %1021 = vst [vmem:[%s1874_s6 + $0x2c] sm:$0x3] %v1016_v58  ;;  %v1022_v59 = vmul.f32 0.95, %v1016_v58  ;;  %vm1017_vm2 = vcmp.gt.f32.partialorder %v1016_v58, 1.0 }
 0x2ce   :  { %v1100_v61 = vsel %vm1017_vm2, 1.0, %v1506_v3 }
 0x2cf   :  { %v1025_v62 = vadd.f32 %v1023_v60, %v1022_v59  ;;  %1020 = vst [vmem:[%s1873_s5 + $0x2c] sm:$0x3] %v1100_v61 }
 0x2d1   :  { %v1026_v63 = vsub.f32 %v1025_v62, %v1100_v61 }
 0x2d3   :  { %vm1027_vm3 = vcmp.gt.f32.partialorder %v1026_v63, 1.0  ;;  %1031 = vst [vmem:[%s1874_s6 + $0x2e] sm:$0x3] %v1026_v63  ;;  %v1032_v1 = vmul.f32 0.95, %v1026_v63 }
 0x2d4   :  { %v1101_v2 = vsel %vm1027_vm3, 1.0, %v1506_v3 }
 0x2d5   :  { %1030 = vst [vmem:[%s1873_s5 + $0x2e] sm:$0x3] %v1101_v2  ;;  %v1033_v4 = vadd.f32 %v1032_v1, %v796_v0 }
 0x2d7   :  { %v1034_v5 = vsub.f32 %v1033_v4, %v1101_v2 }
 0x2d9   :  { %vm1035_vm4 = vcmp.gt.f32.partialorder %v1034_v5, 1.0  ;;  %1039 = vst [vmem:[%s1874_s6 + $0x30] sm:$0x3] %v1034_v5 }
 0x2da   :  { %v1102_v57 = vsel %vm1035_vm4, 1.0, %v1506_v3 }
 0x2db   :  { %1038 = vst [vmem:[%s1873_s5 + $0x30] sm:$0x3] %v1102_v57 }
 0x2dc   :  { %1048 = vsyncpa [#allocation4], 1 }
 0x2dd   :  { %1049 = vsyncpa [#allocation6], 1 }

</bundles_post_ra>
